<compile_context>
chip_gen: v6e
topology: v6e:2x2x1
jax: 0.10.0
libtpu: 0.0.40
codegen_flags: <defaults>
</compile_context>

<pallas_src>
import functools

import jax
import jax.numpy as jnp
from jax.experimental import pallas as pl
from jax.experimental.pallas import tpu as pltpu

EPS = 1e-5


def _round_up(x, m):
    return (x + m - 1) // m * m


def _choose_tm(m, tm_max=512):
    """Row-tile size: >=2 tiles when m is big enough (v7x megacore), tm%16==0."""
    if m <= 32:
        return _round_up(m, 16)
    return min(tm_max, _round_up(pl.cdiv(m, 2), 16))


# ----------------------------------------------------------------------------
# Kernel 1: tiled matmul (bf16 -> f32 acc) + per-tile channel sum / sum-of-sq.
# Raw (pre-BN) output is stored in bf16; stats come from the f32 accumulator.
# ----------------------------------------------------------------------------
def _matmul_stats_kernel(p_ref, w_ref, y_ref, s_ref):
    # p_ref: (TM, K) bf16 (padded rows are zero), w_ref: (K, C_pad) bf16
    # y_ref: (TM, C_pad) bf16 (raw conv output), s_ref: (1, 2, C_pad) f32
    y = jnp.dot(p_ref[...], w_ref[...], preferred_element_type=jnp.float32)
    y_ref[...] = y.astype(y_ref.dtype)
    ssum = jnp.sum(y, axis=0, keepdims=True)        # (1, C_pad)
    ssq = jnp.sum(y * y, axis=0, keepdims=True)     # (1, C_pad)
    s_ref[...] = jnp.concatenate([ssum, ssq], axis=0)[None]


# ----------------------------------------------------------------------------
# Kernel 2: fused (producer BN scale/shift + ReLU on the patches) -> matmul
#           -> raw bf16 output + stats.  scale_k/shift_k are the per-channel
#           BN params replicated 9x along the patch K axis.
# ----------------------------------------------------------------------------
def _affine_relu_matmul_stats_kernel(p_ref, sk_ref, bk_ref, w_ref, y_ref, s_ref,
                                     *, tm, m_valid, need_row_mask):
    p = p_ref[...].astype(jnp.float32) * sk_ref[...] + bk_ref[...]
    p = jnp.maximum(p, 0.0)
    if need_row_mask:
        # Padded rows are zero *before* the affine; after +shift they would be
        # non-zero and poison the BN stats, so mask them out.
        row = jax.lax.broadcasted_iota(jnp.int32, (p.shape[0], 1), 0)
        row = row + pl.program_id(0) * tm
        p = jnp.where(row < m_valid, p, 0.0)
    y = jnp.dot(p.astype(jnp.bfloat16), w_ref[...],
                preferred_element_type=jnp.float32)
    y_ref[...] = y.astype(y_ref.dtype)
    ssum = jnp.sum(y, axis=0, keepdims=True)
    ssq = jnp.sum(y * y, axis=0, keepdims=True)
    s_ref[...] = jnp.concatenate([ssum, ssq], axis=0)[None]


# ----------------------------------------------------------------------------
# Wrapper: one 3x3-conv-as-matmul pallas_call (optionally with fused producer
# BN+ReLU applied to the patches).  Returns raw bf16 y and per-tile stats.
# ----------------------------------------------------------------------------
def _conv_pallas(pats_bf16, w_pad_bf16, affine=None):
    m, k = pats_bf16.shape
    c_pad = w_pad_bf16.shape[1]
    tm = _choose_tm(m)
    num_tiles = pl.cdiv(m, tm)
    m_pad = num_tiles * tm
    if m_pad != m:
        pats_bf16 = jnp.pad(pats_bf16, ((0, m_pad - m), (0, 0)))

    cp = pltpu.CompilerParams(dimension_semantics=("parallel",))
    out_shape = (jax.ShapeDtypeStruct((m_pad, c_pad), jnp.bfloat16),
                 jax.ShapeDtypeStruct((num_tiles, 2, c_pad), jnp.float32))
    out_specs = (pl.BlockSpec((tm, c_pad), lambda i: (i, 0)),
                 pl.BlockSpec((1, 2, c_pad), lambda i: (i, 0, 0)))
    cost = pl.CostEstimate(
        flops=2 * m_pad * k * c_pad,
        transcendentals=0,
        bytes_accessed=(m_pad * k * 2 + k * c_pad * 2
                        + m_pad * c_pad * 2 + num_tiles * 2 * c_pad * 4))

    if affine is None:
        y, stats = pl.pallas_call(
            _matmul_stats_kernel,
            out_shape=out_shape,
            grid=(num_tiles,),
            in_specs=[pl.BlockSpec((tm, k), lambda i: (i, 0)),
                      pl.BlockSpec((k, c_pad), lambda i: (0, 0))],
            out_specs=out_specs,
            compiler_params=cp,
            cost_estimate=cost,
        )(pats_bf16, w_pad_bf16)
    else:
        scale_k, shift_k = affine
        kern = functools.partial(_affine_relu_matmul_stats_kernel,
                                 tm=tm, m_valid=m, need_row_mask=(m_pad != m))
        y, stats = pl.pallas_call(
            kern,
            out_shape=out_shape,
            grid=(num_tiles,),
            in_specs=[pl.BlockSpec((tm, k), lambda i: (i, 0)),
                      pl.BlockSpec((1, k), lambda i: (0, 0)),
                      pl.BlockSpec((1, k), lambda i: (0, 0)),
                      pl.BlockSpec((k, c_pad), lambda i: (0, 0))],
            out_specs=out_specs,
            compiler_params=cp,
            cost_estimate=cost,
        )(pats_bf16, scale_k, shift_k, w_pad_bf16)
    return y, stats


# ----------------------------------------------------------------------------
# Tiny per-channel reduction + BN (training mode, biased var) fold (plain JAX).
# ----------------------------------------------------------------------------
def _fold_bn(stats, gamma, beta, m_true, cout, c_pad):
    ssum = jnp.sum(stats[:, 0, :], axis=0)               # (c_pad,)
    ssq = jnp.sum(stats[:, 1, :], axis=0)
    mean = ssum / m_true
    var = jnp.maximum(ssq / m_true - mean * mean, 0.0)    # biased variance
    inv_std = jax.lax.rsqrt(var + EPS)
    g = jnp.zeros((1, c_pad), jnp.float32).at[:, :cout].set(gamma.reshape(1, cout))
    b = jnp.zeros((1, c_pad), jnp.float32).at[:, :cout].set(beta.reshape(1, cout))
    scale = g * inv_std[None, :]                          # pad channels -> 0
    shift = b - mean[None, :] * scale
    return scale, shift


# ----------------------------------------------------------------------------
# XLA glue: bf16 NHWC im2col (lane-dense), bilinear upsample, channel concat.
# ----------------------------------------------------------------------------
def _im2col_nhwc(x_bf16):
    n, h, w, c = x_bf16.shape
    ho, wo = h - 2, w - 2
    cols = [x_bf16[:, kh:kh + ho, kw:kw + wo, :]
            for kh in range(3) for kw in range(3)]
    pats = jnp.concatenate(cols, axis=-1).reshape(n * ho * wo, 9 * c)
    return pats, (n, ho, wo)


def _interp_matrix(out_size, in_size):
    """torch bilinear align_corners=True interpolation matrix."""
    if out_size == 1:
        coords = jnp.zeros((1,), jnp.float32)
    else:
        coords = jnp.arange(out_size, dtype=jnp.float32) * (
            (in_size - 1) / (out_size - 1))
    lo = jnp.floor(coords)
    lo_i = jnp.clip(lo.astype(jnp.int32), 0, in_size - 1)
    hi_i = jnp.clip(lo_i + 1, 0, in_size - 1)
    wgt = (coords - lo).astype(jnp.float32)
    return (jax.nn.one_hot(lo_i, in_size, dtype=jnp.float32) * (1.0 - wgt)[:, None]
            + jax.nn.one_hot(hi_i, in_size, dtype=jnp.float32) * wgt[:, None])


def bilinear_upsample_nhwc(x, out_h, out_w):
    _, h, w, _ = x.shape
    rh = _interp_matrix(out_h, h)
    rw = _interp_matrix(out_w, w)
    x = jnp.einsum("hp,npqc->nhqc", rh, x)
    x = jnp.einsum("wq,nhqc->nhwc", rw, x)
    return x


# ----------------------------------------------------------------------------
# DecoderBlock forward (external layout: PyTorch NCHW).
# ----------------------------------------------------------------------------
def decoder_block_forward(x, skip, params):
    """x: (N, Cx, Hx, Wx), skip: (N, Cs, Hs, Ws) -> (N, Cout, Hs-4, Ws-4)."""
    x = jnp.transpose(x, (0, 2, 3, 1))          # NCHW -> NHWC
    skip = jnp.transpose(skip, (0, 2, 3, 1))
    hs, ws = skip.shape[1], skip.shape[2]
    x_up = bilinear_upsample_nhwc(x, hs, ws)
    x_cat = jnp.concatenate([x_up, skip], axis=-1).astype(jnp.bfloat16)

    mid = params["g1"].shape[-1]
    out_ch = params["g2"].shape[-1]
    c1_pad = _round_up(mid, 128)
    c2_pad = _round_up(out_ch, 128)

    # ---- conv1: raw matmul + per-tile stats (BN1+ReLU deferred to conv2) ----
    pats1, (n1, ho1, wo1) = _im2col_nhwc(x_cat)
    m1 = pats1.shape[0]
    w1_pad = jnp.pad(params["w1"].astype(jnp.bfloat16),
                     ((0, 0), (0, c1_pad - mid)))
    y1, stats1 = _conv_pallas(pats1, w1_pad)
    scale1, shift1 = _fold_bn(stats1, params["g1"], params["beta1"],
                              m1, mid, c1_pad)

    # Raw (pre-BN) y1 back to NHWC (bf16, channel-padded) for conv2's im2col.
    y1_nhwc = y1[:m1].reshape(n1, ho1, wo1, c1_pad)

    # ---- conv2: fused BN1 scale/shift + ReLU on patches, matmul, stats ----
    pats2, (n2, ho2, wo2) = _im2col_nhwc(y1_nhwc)
    m2 = pats2.shape[0]
    w2 = params["w2"].reshape(9, mid, out_ch)                 # (kh*kw, cin, cout)
    w2_pad = jnp.pad(w2, ((0, 0), (0, c1_pad - mid), (0, c2_pad - out_ch)))
    w2_pad = w2_pad.reshape(9 * c1_pad, c2_pad).astype(jnp.bfloat16)
    scale_k = jnp.tile(scale1, (1, 9))                        # (1, 9*c1_pad)
    shift_k = jnp.tile(shift1, (1, 9))
    y2, stats2 = _conv_pallas(pats2, w2_pad, affine=(scale_k, shift_k))
    scale2, shift2 = _fold_bn(stats2, params["g2"], params["beta2"],
                              m2, out_ch, c2_pad)

    # ---- BN2 + ReLU folded into the un-pad / f32 cast / transpose (XLA) ----
    y2_valid = y2[:m2, :out_ch].astype(jnp.float32)
    out = jnp.maximum(y2_valid * scale2[:, :out_ch] + shift2[:, :out_ch], 0.0)
    out = out.reshape(n2, ho2, wo2, out_ch)
    return jnp.transpose(out, (0, 3, 1, 2))     # NHWC -> NCHW


def make_params(key, in_ch, mid_ch, out_ch):
    ks = jax.random.split(key, 4)
    # PyTorch Conv2d weight (Cout, Cin, 3, 3) -> flatten to (9*Cin, Cout) in
    # (kh, kw, cin) order to match the NHWC im2col patch order.
    w1 = 0.1 * jax.random.normal(ks[0], (mid_ch, in_ch, 3, 3), jnp.float32)
    w2 = 0.1 * jax.random.normal(ks[1], (out_ch, mid_ch, 3, 3), jnp.float32)
    # NOTE: conv biases omitted — exactly cancelled by training-mode BatchNorm
    # mean subtraction, so the forward pass is unchanged.
    return {
        "w1": w1.transpose(2, 3, 1, 0).reshape(9 * in_ch, mid_ch),
        "g1": 1.0 + 0.1 * jax.random.normal(ks[2], (1, mid_ch), jnp.float32),
        "beta1": 0.02 * jnp.arange(mid_ch, dtype=jnp.float32).reshape(1, mid_ch),
        "w2": w2.transpose(2, 3, 1, 0).reshape(9 * mid_ch, out_ch),
        "g2": 1.0 + 0.1 * jax.random.normal(ks[3], (1, out_ch), jnp.float32),
        "beta2": 0.02 * jnp.arange(out_ch, dtype=jnp.float32).reshape(1, out_ch),
    }


if __name__ == "__main__":
    key = jax.random.PRNGKey(0)
    kx, ks_, kp = jax.random.split(key, 3)

    # x is the low-res decoder feature, skip is the encoder feature.
    N, CX, CS = 2, 4, 4
    x = jax.random.normal(kx, (N, CX, 8, 8), jnp.float32)
    skip = jax.random.normal(ks_, (N, CS, 16, 16), jnp.float32)

    in_ch = CX + CS          # channels after concat
    mid_ch, out_ch = 8, 8
    params = make_params(kp, in_ch, mid_ch, out_ch)

    fwd = jax.jit(functools.partial(decoder_block_forward, params=params))
    out = fwd(x, skip)
    jax.block_until_ready(out)

    assert out.shape == (N, out_ch, 12, 12), out.shape
    assert bool(jnp.all(jnp.isfinite(out)))
    print("KERNEL_OK")
</pallas_src>

<mosaic_0001>
module attributes {stable_mosaic.version = 11 : i64} {
  func.func @_matmul_stats_kernel(%arg0: i32, %arg1: memref<208x72xbf16, #tpu.memory_space<vmem>>, %arg2: memref<72x128xbf16, #tpu.memory_space<vmem>>, %arg3: memref<208x128xbf16, #tpu.memory_space<vmem>>, %arg4: memref<1x2x128xf32, #tpu.memory_space<vmem>>) attributes {dimension_semantics = [#tpu.dimension_semantics<parallel>], iteration_bounds = array<i64: 2>, scalar_prefetch = 0 : i64, scratch_operands = 0 : i64, tpu.core_type = #tpu.core_type<tc>, window_params = [{transform_indices = @transform_0, window_bounds = array<i64: 208, 72>}, {pipeline_mode = #tpu.pipeline_mode<synchronous>, transform_indices = @transform_1, window_bounds = array<i64: 72, 128>}, {transform_indices = @transform_2, window_bounds = array<i64: 208, 128>}, {transform_indices = @transform_3, window_bounds = array<i64: 1, 2, 128>}]} {
    %c0 = arith.constant 0 : index
    %c0_0 = arith.constant 0 : index
    %0 = vector.load %arg1[%c0, %c0_0] : memref<208x72xbf16, #tpu.memory_space<vmem>>, vector<208x72xbf16>
    %c0_1 = arith.constant 0 : index
    %c0_2 = arith.constant 0 : index
    %1 = vector.load %arg2[%c0_1, %c0_2] : memref<72x128xbf16, #tpu.memory_space<vmem>>, vector<72x128xbf16>
    %cst = arith.constant dense<0.000000e+00> : vector<208x128xf32>
    %2 = tpu.matmul %0, %1, %cst {dimension_numbers = #tpu.dot_dimension_numbers<[1], [0], [0], [1], [0, 0, 1, 1], [], []>} : vector<208x72xbf16>, vector<72x128xbf16>, vector<208x128xf32> -> vector<208x128xf32>
    %3 = arith.truncf %2 : vector<208x128xf32> to vector<208x128xbf16>
    %c0_3 = arith.constant 0 : index
    %c0_4 = arith.constant 0 : index
    %4 = vector.load %arg3[%c0_3, %c0_4] : memref<208x128xbf16, #tpu.memory_space<vmem>>, vector<208x128xbf16>
    tpu.vector_store %arg3[%c0_3, %c0_4], %3 {strides = array<i32>} : memref<208x128xbf16, #tpu.memory_space<vmem>>, vector<208x128xbf16>,
    %cst_5 = arith.constant dense<0.000000e+00> : vector<128xf32>
    %5 = vector.multi_reduction <add>, %2, %cst_5 [0] : vector<208x128xf32> to vector<128xf32>
    %6 = vector.shape_cast %5 : vector<128xf32> to vector<1x128xf32>
    %7 = arith.mulf %2, %2 : vector<208x128xf32>
    %cst_6 = arith.constant dense<0.000000e+00> : vector<128xf32>
    %8 = vector.multi_reduction <add>, %7, %cst_6 [0] : vector<208x128xf32> to vector<128xf32>
    %9 = vector.shape_cast %8 : vector<128xf32> to vector<1x128xf32>
    %10 = tpu.concatenate %6, %9 in 0 : vector<1x128xf32>, vector<1x128xf32> -> vector<2x128xf32>
    %11 = vector.shape_cast %10 : vector<2x128xf32> to vector<1x2x128xf32>
    %c0_7 = arith.constant 0 : index
    %c0_8 = arith.constant 0 : index
    %c0_9 = arith.constant 0 : index
    %12 = vector.load %arg4[%c0_7, %c0_8, %c0_9] : memref<1x2x128xf32, #tpu.memory_space<vmem>>, vector<1x2x128xf32>
    tpu.vector_store %arg4[%c0_7, %c0_8, %c0_9], %11 {strides = array<i32>} : memref<1x2x128xf32, #tpu.memory_space<vmem>>, vector<1x2x128xf32>,
    return
  }
  func.func @transform_0(%arg0: i32) -> (i32, i32) {
    %c0_i32 = arith.constant 0 : i32
    %c0_i32_0 = arith.constant 0 : i32
    return %arg0, %c0_i32 : i32, i32
  }
  func.func @transform_1(%arg0: i32) -> (i32, i32) {
    %c0_i32 = arith.constant 0 : i32
    %c0_i32_0 = arith.constant 0 : i32
    %c0_i32_1 = arith.constant 0 : i32
    return %c0_i32, %c0_i32_0 : i32, i32
  }
  func.func @transform_2(%arg0: i32) -> (i32, i32) {
    %c0_i32 = arith.constant 0 : i32
    %c0_i32_0 = arith.constant 0 : i32
    return %arg0, %c0_i32 : i32, i32
  }
  func.func @transform_3(%arg0: i32) -> (i32, i32, i32) {
    %c0_i32 = arith.constant 0 : i32
    %c0_i32_0 = arith.constant 0 : i32
    %c0_i32_1 = arith.constant 0 : i32
    return %arg0, %c0_i32, %c0_i32_0 : i32, i32, i32
  }
}

module attributes {stable_mosaic.version = 11 : i64} {
  func.func @_affine_relu_matmul_stats_kernel(%arg0: i32, %arg1: memref<144x1152xbf16, #tpu.memory_space<vmem>>, %arg2: memref<1x1152xf32, #tpu.memory_space<vmem>>, %arg3: memref<1x1152xf32, #tpu.memory_space<vmem>>, %arg4: memref<1152x128xbf16, #tpu.memory_space<vmem>>, %arg5: memref<144x128xbf16, #tpu.memory_space<vmem>>, %arg6: memref<1x2x128xf32, #tpu.memory_space<vmem>>) attributes {dimension_semantics = [#tpu.dimension_semantics<parallel>], iteration_bounds = array<i64: 2>, scalar_prefetch = 0 : i64, scratch_operands = 0 : i64, tpu.core_type = #tpu.core_type<tc>, window_params = [{transform_indices = @transform_0, window_bounds = array<i64: 144, 1152>}, {pipeline_mode = #tpu.pipeline_mode<synchronous>, transform_indices = @transform_1, window_bounds = array<i64: 1, 1152>}, {pipeline_mode = #tpu.pipeline_mode<synchronous>, transform_indices = @transform_2, window_bounds = array<i64: 1, 1152>}, {pipeline_mode = #tpu.pipeline_mode<synchronous>, transform_indices = @transform_3, window_bounds = array<i64: 1152, 128>}, {transform_indices = @transform_4, window_bounds = array<i64: 144, 128>}, {transform_indices = @transform_5, window_bounds = array<i64: 1, 2, 128>}]} {
    %c0 = arith.constant 0 : index
    %c0_0 = arith.constant 0 : index
    %0 = vector.load %arg1[%c0, %c0_0] : memref<144x1152xbf16, #tpu.memory_space<vmem>>, vector<144x1152xbf16>
    %1 = arith.extf %0 : vector<144x1152xbf16> to vector<144x1152xf32>
    %c0_1 = arith.constant 0 : index
    %c0_2 = arith.constant 0 : index
    %2 = vector.load %arg2[%c0_1, %c0_2] : memref<1x1152xf32, #tpu.memory_space<vmem>>, vector<1x1152xf32>
    %3 = vector.broadcast %2 : vector<1x1152xf32> to vector<144x1152xf32>
    %4 = arith.mulf %1, %3 : vector<144x1152xf32>
    %c0_3 = arith.constant 0 : index
    %c0_4 = arith.constant 0 : index
    %5 = vector.load %arg3[%c0_3, %c0_4] : memref<1x1152xf32, #tpu.memory_space<vmem>>, vector<1x1152xf32>
    %6 = vector.broadcast %5 : vector<1x1152xf32> to vector<144x1152xf32>
    %7 = arith.addf %4, %6 : vector<144x1152xf32>
    %cst = arith.constant 0.000000e+00 : f32
    %8 = vector.broadcast %cst : f32 to vector<144x1152xf32>
    %9 = arith.maximumf %7, %8 : vector<144x1152xf32>
    %10 = arith.truncf %9 : vector<144x1152xf32> to vector<144x1152xbf16>
    %c0_5 = arith.constant 0 : index
    %c0_6 = arith.constant 0 : index
    %11 = vector.load %arg4[%c0_5, %c0_6] : memref<1152x128xbf16, #tpu.memory_space<vmem>>, vector<1152x128xbf16>
    %cst_7 = arith.constant dense<0.000000e+00> : vector<144x128xf32>
    %12 = tpu.matmul %10, %11, %cst_7 {dimension_numbers = #tpu.dot_dimension_numbers<[1], [0], [0], [1], [0, 0, 1, 1], [], []>} : vector<144x1152xbf16>, vector<1152x128xbf16>, vector<144x128xf32> -> vector<144x128xf32>
    %13 = arith.truncf %12 : vector<144x128xf32> to vector<144x128xbf16>
    %c0_8 = arith.constant 0 : index
    %c0_9 = arith.constant 0 : index
    %14 = vector.load %arg5[%c0_8, %c0_9] : memref<144x128xbf16, #tpu.memory_space<vmem>>, vector<144x128xbf16>
    tpu.vector_store %arg5[%c0_8, %c0_9], %13 {strides = array<i32>} : memref<144x128xbf16, #tpu.memory_space<vmem>>, vector<144x128xbf16>,
    %cst_10 = arith.constant dense<0.000000e+00> : vector<128xf32>
    %15 = vector.multi_reduction <add>, %12, %cst_10 [0] : vector<144x128xf32> to vector<128xf32>
    %16 = vector.shape_cast %15 : vector<128xf32> to vector<1x128xf32>
    %17 = arith.mulf %12, %12 : vector<144x128xf32>
    %cst_11 = arith.constant dense<0.000000e+00> : vector<128xf32>
    %18 = vector.multi_reduction <add>, %17, %cst_11 [0] : vector<144x128xf32> to vector<128xf32>
    %19 = vector.shape_cast %18 : vector<128xf32> to vector<1x128xf32>
    %20 = tpu.concatenate %16, %19 in 0 : vector<1x128xf32>, vector<1x128xf32> -> vector<2x128xf32>
    %21 = vector.shape_cast %20 : vector<2x128xf32> to vector<1x2x128xf32>
    %c0_12 = arith.constant 0 : index
    %c0_13 = arith.constant 0 : index
    %c0_14 = arith.constant 0 : index
    %22 = vector.load %arg6[%c0_12, %c0_13, %c0_14] : memref<1x2x128xf32, #tpu.memory_space<vmem>>, vector<1x2x128xf32>
    tpu.vector_store %arg6[%c0_12, %c0_13, %c0_14], %21 {strides = array<i32>} : memref<1x2x128xf32, #tpu.memory_space<vmem>>, vector<1x2x128xf32>,
    return
  }
  func.func @transform_0(%arg0: i32) -> (i32, i32) {
    %c0_i32 = arith.constant 0 : i32
    %c0_i32_0 = arith.constant 0 : i32
    return %arg0, %c0_i32 : i32, i32
  }
  func.func @transform_1(%arg0: i32) -> (i32, i32) {
    %c0_i32 = arith.constant 0 : i32
    %c0_i32_0 = arith.constant 0 : i32
    %c0_i32_1 = arith.constant 0 : i32
    return %c0_i32, %c0_i32_0 : i32, i32
  }
  func.func @transform_2(%arg0: i32) -> (i32, i32) {
    %c0_i32 = arith.constant 0 : i32
    %c0_i32_0 = arith.constant 0 : i32
    %c0_i32_1 = arith.constant 0 : i32
    return %c0_i32, %c0_i32_0 : i32, i32
  }
  func.func @transform_3(%arg0: i32) -> (i32, i32) {
    %c0_i32 = arith.constant 0 : i32
    %c0_i32_0 = arith.constant 0 : i32
    %c0_i32_1 = arith.constant 0 : i32
    return %c0_i32, %c0_i32_0 : i32, i32
  }
  func.func @transform_4(%arg0: i32) -> (i32, i32) {
    %c0_i32 = arith.constant 0 : i32
    %c0_i32_0 = arith.constant 0 : i32
    return %arg0, %c0_i32 : i32, i32
  }
  func.func @transform_5(%arg0: i32) -> (i32, i32, i32) {
    %c0_i32 = arith.constant 0 : i32
    %c0_i32_0 = arith.constant 0 : i32
    %c0_i32_1 = arith.constant 0 : i32
    return %arg0, %c0_i32, %c0_i32_0 : i32, i32, i32
  }
}

</mosaic_0001>

<bundles_post_ra>
// kernel: decoder_block_forward.2
= control target key start
LH: loop header
LB: loop body
LE: loop exit
PB: predicated region body
PF: predicated region fallthrough
CT: control target
= control target key end

     0   :  { %s1120_s12 = smov 0   ;;  %s1312_s0 = inlined_call_operand.vmem [shape: bf16[416,72], index: 0, kind: input, shape index: {}]   ;;  %s1313_s1 = inlined_call_operand.vmem [shape: bf16[72,128], index: 1, kind: input, shape index: {}]   ;;  %s1314_s2 = inlined_call_operand.vmem [shape: bf16[416,128], index: 2, kind: output, shape index: {0}]   ;;  %s1315_s3 = inlined_call_operand.vmem [shape: f32[2,2,128], index: 3, kind: output, shape index: {1}]  }
   0x1 LB: > { %s1126_s13 = sadd.s32 4294967295, %s1096_s12   ;;  %p806_p0 = scmp.ge.s32.totalorder %s1096_s12, 1  ;;  %s1096_s12 = sphi %s1120_s12, %s14_s12  }
   0x2   : > { %p141_p1 = scmp.lt.s32.totalorder %s1096_s12, 3 }
   0x4   : > { %p142_p2 = pnand %p806_p0, %p141_p1 }
   0x5   : > { %s169_s18 = smul.u32 (!%p142_p2), 26, %s1126_s13  ;;  %p181_p4 = scmp.lt.s32.totalorder (!%p142_p2), %s1126_s13, 1 }
   0x6   : > { %145 = sbr.rel (%p142_p2) target bundleno = 320 (0x140), region = 28 }
   0x7   : > { %p170_p3 = scmp.lt.s32.totalorder (!%p142_p2), %s169_s18, 51 }
   0xb   : > { %v1072_v0 = vld [vmem:[%s1313_s1 + $0x20] ss:$0 sps:$4 sm:$0xff]   ;;  %vm353_vm0 = vcmask 1043456   ;;  %v1098_v1 = vmov 0.0   ;;  %vm1099_vm1 = vmmov 0   ;;  %v1073_v3 = vld [vmem:[%s1313_s1 + $0x18] sm:$0xff]  }
   0xc   : > { %990 = vmatprep.subr.bf16.mxu0 %v1098_v1  ;;  %1052 = vmatprep.subr.bf16.mxu1 %v1098_v1  ;;  %v355_v2 = vsel %vm353_vm0, %v1072_v0, 0  ;;  %v1074_v4 = vld [vmem:[%s1313_s1 + $0x10] sm:$0xff]   ;;  %s1317_s18 = smov (!%p170_p3, %s169_s18), 51  ;;  %v1075_v5 = vld [vmem:[%s1313_s1 + $0x8] sm:$0xff]   ;;  %v1076_v6 = vld [vmem:[%s1313_s1] sm:$0xff]   ;;  %vm313_vm2 = vcmask 588800  }
   0xd   : > { %1000 = vmatprep.mubr.msk.bf16.mxu0 %vm1099_vm1, %v1098_v1  ;;  %1028 = vmatprep.mubr.msk.bf16.mxu1 %vm1099_vm1, %v1098_v1  ;;  %s807_s21 = sshll.u32 %s1317_s18, 2  ;;  %s1319_s13 = smov (!%p181_p4, %s1126_s13), 1  ;;  %vm712_vm3 = vcmask 1040384  }
   0xe   : > { %991 = vmatpush3.bf16.msra.mxu0 %v355_v2  ;;  %1057 = vmatpush3.bf16.msra.mxu1 %v355_v2  ;;  %s1158_s24 = scalar_lea.vmem %s1312_s0, %s807_s21  ;;  %s1225_s4 = scalar_lea.vmem %s1314_s2, %s807_s21 }
   0xf   : > { %992 = vmatprep.subr.bf16.mxu0 %v1098_v1  ;;  %1053 = vmatprep.subr.bf16.mxu1 %v1098_v1  ;;  %v1077_v7 = vld [vmem:[%s1158_s24] sm:$0xff]   ;;  %v1081_v8 = vld [vmem:[%s1158_s24 + $0x38] sm:$0xff]   ;;  %v1078_v9 = vld [vmem:[%s1158_s24 + $0x8] sm:$0xff]   ;;  %s809_s5 = sshll.u32 %s1319_s13, 1 }
  0x10   : > { %v1083_v10 = vld [vmem:[%s1158_s24 + $0x40] sm:$0xff]   ;;  %v1079_v11 = vld [vmem:[%s1158_s24 + $0x10] sm:$0xff]   ;;  %v1085_v12 = vld [vmem:[%s1158_s24 + $0x48] sm:$0xff]   ;;  %s184_s8 = scalar_lea.vmem %s1315_s3, %s809_s5 }
  0x11   : > { %v1080_v13 = vld [vmem:[%s1158_s24 + $0x18] sm:$0xff]   ;;  %v1087_v14 = vld [vmem:[%s1158_s24 + $0x50] sm:$0xff]   ;;  %v1082_v15 = vld [vmem:[%s1158_s24 + $0x20] sm:$0xff]  }
  0x12   : > { %993 = vmatpush3.bf16.msra.mxu0 %v1073_v3  ;;  %1058 = vmatpush3.bf16.msra.mxu1 %v1073_v3  ;;  %v1088_v16 = vld [vmem:[%s1158_s24 + $0x58] sm:$0xff]   ;;  %v1084_v17 = vld [vmem:[%s1158_s24 + $0x28] sm:$0xff]   ;;  %v1089_v18 = vld [vmem:[%s1158_s24 + $0x60] sm:$0xff]  }
  0x13   : > { %994 = vmatprep.subr.bf16.mxu0 %v1098_v1  ;;  %1054 = vmatprep.subr.bf16.mxu1 %v1098_v1  ;;  %v1086_v19 = vld [vmem:[%s1158_s24 + $0x30] sm:$0xff]  }
  0x16   : > { %995 = vmatpush3.bf16.msra.mxu0 %v1074_v4  ;;  %1059 = vmatpush3.bf16.msra.mxu1 %v1074_v4 }
  0x17   : > { %996 = vmatprep.subr.bf16.mxu0 %v1098_v1  ;;  %1055 = vmatprep.subr.bf16.mxu1 %v1098_v1 }
  0x1a   : > { %997 = vmatpush3.bf16.msra.mxu0 %v1075_v5  ;;  %1060 = vmatpush3.bf16.msra.mxu1 %v1075_v5 }
  0x1b   : > { %998 = vmatprep.subr.bf16.mxu0 %v1098_v1  ;;  %1056 = vmatprep.subr.bf16.mxu1 %v1098_v1 }
  0x1e   : > { %999 = vmatpush3.bf16.msra.mxu0 %v1076_v6  ;;  %1061 = vmatpush3.bf16.msra.mxu1 %v1076_v6 }
  0x21   : > { %1001 = vmatmul.mubr.msk.bf16.vlgmr.msra.gmra.mxu0 %vm313_vm2, %v1077_v7  ;;  %1029 = vmatmul.mubr.msk.bf16.vlgmr.msra.gmra.mxu1 %vm313_vm2, %v1081_v8 }
  0x22   : > { %1004 = vmatprep.mubr.msk.bf16.mxu0 %vm1099_vm1, %v1098_v1  ;;  %1032 = vmatprep.mubr.msk.bf16.mxu1 %vm1099_vm1, %v1098_v1 }
  0x29   : > { %1005 = vmatmul.mubr.msk.bf16.gmra.mxu0 %vm313_vm2, %v1078_v9  ;;  %1033 = vmatmul.mubr.msk.bf16.gmra.mxu1 %vm313_vm2, %v1083_v10 }
  0x2a   : > { %1008 = vmatprep.mubr.msk.bf16.mxu0 %vm1099_vm1, %v1098_v1  ;;  %1036 = vmatprep.mubr.msk.bf16.mxu1 %vm1099_vm1, %v1098_v1 }
  0x31   : > { %1009 = vmatmul.mubr.msk.bf16.gmra.mxu0 %vm313_vm2, %v1079_v11  ;;  %1037 = vmatmul.mubr.msk.bf16.gmra.mxu1 %vm313_vm2, %v1085_v12 }
  0x32   : > { %1012 = vmatprep.mubr.msk.bf16.mxu0 %vm1099_vm1, %v1098_v1  ;;  %1040 = vmatprep.mubr.msk.bf16.mxu1 %vm1099_vm1, %v1098_v1 }
  0x39   : > { %1013 = vmatmul.mubr.msk.bf16.gmra.mxu0 %vm313_vm2, %v1080_v13  ;;  %1041 = vmatmul.mubr.msk.bf16.gmra.mxu1 %vm313_vm2, %v1087_v14 }
  0x3a   : > { %1016 = vmatprep.mubr.msk.bf16.mxu0 %vm1099_vm1, %v1098_v1  ;;  %1044 = vmatprep.mubr.msk.bf16.mxu1 %vm1099_vm1, %v1098_v1 }
  0x41   : > { %1017 = vmatmul.mubr.msk.bf16.gmra.mxu0 %vm313_vm2, %v1082_v15  ;;  %1045 = vmatmul.mubr.msk.bf16.gmra.mxu1 %vm313_vm2, %v1088_v16 }
  0x42   : > { %1020 = vmatprep.mubr.msk.bf16.mxu0 %vm1099_vm1, %v1098_v1  ;;  %1048 = vmatprep.mubr.msk.bf16.mxu1 %vm1099_vm1, %v1098_v1 }
  0x49   : > { %1021 = vmatmul.mubr.msk.bf16.gmra.mxu0 %vm313_vm2, %v1084_v17  ;;  %1049 = vmatmul.mubr.msk.bf16.gmra.mxu1 %vm313_vm2, %v1089_v18 }
  0x4a   : > { %1024 = vmatprep.mubr.msk.bf16.mxu0 %vm1099_vm1, %v1098_v1 }
  0x51   : > { %1025 = vmatmul.mubr.msk.bf16.gmra.mxu0 %vm313_vm2, %v1086_v19 }
  0xe1   : > { %v391_v20 = vpop.f32.mrf.mxu0  ;;  %v1218_v21 = vpop.f32.mrf.mxu1 }
  0xe2   : > { %v655_v55 = vmul.f32 %v391_v20, %v391_v20 }
  0xe3   : > { %v1002_v22 = vpop.f32.mrf.mxu0  ;;  %v1030_v23 = vpop.f32.mrf.mxu1 }
  0xe5   : > { %v394_v24 = vpop.f32.mrf.mxu0  ;;  %v1227_v25 = vpop.f32.mrf.mxu1 }
  0xe6   : > { %v898_v26 = vpack.c.bf16 %v394_v24, %v391_v20  ;;  %v933_v27 = vpack.c.bf16 %v1227_v25, %v1218_v21  ;;  %v656_v52 = vmul.f32 %v394_v24, %v394_v24  ;;  %v624_v59 = vadd.f32 %v394_v24, %v391_v20 }
  0xe7   : > { %v1003_v28 = vpop.f32.mrf.mxu0  ;;  %v1031_v29 = vpop.f32.mrf.mxu1 }
  0xe8   : > { %899 = vst [vmem:[%s1225_s4] sm:$0xff] %v898_v26   ;;  %966 = vst [vmem:[%s1225_s4 + $0x38] sm:$0xff] %v933_v27   ;;  %v681_v62 = vadd.f32 %v656_v52, %v655_v55 }
  0xe9   : > { %v399_v30 = vpop.f32.mrf.mxu0  ;;  %v1233_v31 = vpop.f32.mrf.mxu1 }
  0xea   : > { %v657_v56 = vmul.f32 %v399_v30, %v399_v30  ;;  %v625_v2 = vadd.f32 %v624_v59, %v399_v30 }
  0xeb   : > { %v1006_v32 = vpop.f32.mrf.mxu0  ;;  %v1034_v33 = vpop.f32.mrf.mxu1 }
  0xec   : > { %v682_v3 = vadd.f32 %v681_v62, %v657_v56 }
  0xed   : > { %v402_v34 = vpop.f32.mrf.mxu0  ;;  %v1235_v35 = vpop.f32.mrf.mxu1 }
  0xee   : > { %v903_v36 = vpack.c.bf16 %v402_v34, %v399_v30  ;;  %v938_v37 = vpack.c.bf16 %v1235_v35, %v1233_v31  ;;  %v658_v63 = vmul.f32 %v402_v34, %v402_v34  ;;  %v626_v7 = vadd.f32 %v625_v2, %v402_v34 }
  0xef   : > { %v1007_v38 = vpop.f32.mrf.mxu0  ;;  %v1035_v39 = vpop.f32.mrf.mxu1 }
  0xf0   : > { %960 = vst [vmem:[%s1225_s4 + $0x8] sm:$0xff] %v903_v36   ;;  %967 = vst [vmem:[%s1225_s4 + $0x40] sm:$0xff] %v938_v37   ;;  %v683_v8 = vadd.f32 %v682_v3, %v658_v63 }
  0xf1   : > { %v407_v40 = vpop.f32.mrf.mxu0  ;;  %v1241_v41 = vpop.f32.mrf.mxu1 }
  0xf2   : > { %v659_v4 = vmul.f32 %v407_v40, %v407_v40  ;;  %v627_v12 = vadd.f32 %v626_v7, %v407_v40 }
  0xf3   : > { %v1010_v42 = vpop.f32.mrf.mxu0  ;;  %v1038_v43 = vpop.f32.mrf.mxu1 }
  0xf4   : > { %v684_v13 = vadd.f32 %v683_v8, %v659_v4  ;;  %v669_v4 = vmul.f32 %v1218_v21, %v1218_v21  ;;  %v670_v8 = vmul.f32 %v1227_v25, %v1227_v25 }
  0xf5   : > { %v410_v44 = vpop.f32.mrf.mxu0  ;;  %v1243_v45 = vpop.f32.mrf.mxu1 }
  0xf6   : > { %v908_v46 = vpack.c.bf16 %v410_v44, %v407_v40  ;;  %v943_v47 = vpack.c.bf16 %v1243_v45, %v1241_v41  ;;  %v660_v9 = vmul.f32 %v410_v44, %v410_v44  ;;  %v628_v17 = vadd.f32 %v627_v12, %v410_v44 }
  0xf7   : > { %v1011_v48 = vpop.f32.mrf.mxu0  ;;  %v1039_v49 = vpop.f32.mrf.mxu1 }
  0xf8   : > { %961 = vst [vmem:[%s1225_s4 + $0x10] sm:$0xff] %v908_v46   ;;  %968 = vst [vmem:[%s1225_s4 + $0x48] sm:$0xff] %v943_v47   ;;  %v685_v20 = vadd.f32 %v684_v13, %v660_v9 }
  0xf9   : > { %v415_v50 = vpop.f32.mrf.mxu0  ;;  %v1249_v51 = vpop.f32.mrf.mxu1 }
  0xfa   : > { %v661_v14 = vmul.f32 %v415_v50, %v415_v50  ;;  %v629_v26 = vadd.f32 %v628_v17, %v415_v50 }
  0xfb   : > { %v1014_v53 = vpop.f32.mrf.mxu0  ;;  %v1042_v54 = vpop.f32.mrf.mxu1 }
  0xfc   : > { %v686_v27 = vadd.f32 %v685_v20, %v661_v14  ;;  %v672_v14 = vmul.f32 %v1235_v35, %v1235_v35 }
  0xfd   : > { %v418_v57 = vpop.f32.mrf.mxu0  ;;  %v1251_v58 = vpop.f32.mrf.mxu1 }
  0xfe   : > { %v913_v60 = vpack.c.bf16 %v418_v57, %v415_v50  ;;  %v948_v61 = vpack.c.bf16 %v1251_v58, %v1249_v51  ;;  %v662_v22 = vmul.f32 %v418_v57, %v418_v57  ;;  %v630_v32 = vadd.f32 %v629_v26, %v418_v57 }
  0xff   : > { %v1015_v0 = vpop.f32.mrf.mxu0  ;;  %v1043_v1 = vpop.f32.mrf.mxu1  ;;  %v676_v26 = vmul.f32 %v1251_v58, %v1251_v58 }
 0x100   : > { %962 = vst [vmem:[%s1225_s4 + $0x18] sm:$0xff] %v913_v60   ;;  %969 = vst [vmem:[%s1225_s4 + $0x50] sm:$0xff] %v948_v61   ;;  %v687_v33 = vadd.f32 %v686_v27, %v662_v22 }
 0x101   : > { %v423_v5 = vpop.f32.mrf.mxu0  ;;  %v1257_v6 = vpop.f32.mrf.mxu1 }
 0x102   : > { %v663_v28 = vmul.f32 %v423_v5, %v423_v5  ;;  %v631_v37 = vadd.f32 %v630_v32, %v423_v5 }
 0x103   : > { %v1018_v10 = vpop.f32.mrf.mxu0  ;;  %v1046_v11 = vpop.f32.mrf.mxu1 }
 0x104   : > { %v688_v39 = vadd.f32 %v687_v33, %v663_v28  ;;  %v671_v11 = vmul.f32 %v1233_v31, %v1233_v31 }
 0x105   : > { %v426_v15 = vpop.f32.mrf.mxu0  ;;  %v1259_v16 = vpop.f32.mrf.mxu1 }
 0x106   : > { %v918_v18 = vpack.c.bf16 %v426_v15, %v423_v5  ;;  %v953_v19 = vpack.c.bf16 %v1259_v16, %v1257_v6  ;;  %v664_v38 = vmul.f32 %v426_v15, %v426_v15  ;;  %v632_v43 = vadd.f32 %v631_v37, %v426_v15 }
 0x107   : > { %v1019_v23 = vpop.f32.mrf.mxu0  ;;  %v1047_v24 = vpop.f32.mrf.mxu1 }
 0x108   : > { %963 = vst [vmem:[%s1225_s4 + $0x20] sm:$0xff] %v918_v18   ;;  %970 = vst [vmem:[%s1225_s4 + $0x58] sm:$0xff] %v953_v19   ;;  %v689_v50 = vadd.f32 %v688_v39, %v664_v38 }
 0x109   : > { %v431_v29 = vpop.f32.mrf.mxu0  ;;  %v1265_v30 = vpop.f32.mrf.mxu1 }
 0x10a   : > { %v665_v44 = vmul.f32 %v431_v29, %v431_v29  ;;  %v633_v52 = vadd.f32 %v632_v43, %v431_v29 }
 0x10b   : > { %v1022_v34 = vpop.f32.mrf.mxu0  ;;  %v1050_v36 = vpop.f32.mrf.mxu1 }
 0x10c   : > { %v690_v55 = vadd.f32 %v689_v50, %v665_v44 }
 0x10d   : > { %v434_v40 = vpop.f32.mrf.mxu0  ;;  %v490_v42 = vpop.f32.mrf.mxu1 }
 0x10e   : > { %v923_v46 = vpack.c.bf16 %v434_v40, %v431_v29  ;;  %v958_v47 = vpack.c.bf16 %v490_v42, %v1265_v30  ;;  %v666_v53 = vmul.f32 %v434_v40, %v434_v40  ;;  %v634_v56 = vadd.f32 %v633_v52, %v434_v40 }
 0x10f   : > { %v1023_v48 = vpop.f32.mrf.mxu0  ;;  %v1051_v49 = vpop.f32.mrf.mxu1  ;;  %v680_v38 = vmul.f32 %v490_v42, %v490_v42 }
 0x110   : > { %964 = vst [vmem:[%s1225_s4 + $0x28] sm:$0xff] %v923_v46   ;;  %971 = vst [vmem:[%s1225_s4 + $0x60] sm:$0xff] %v958_v47   ;;  %v691_v60 = vadd.f32 %v690_v55, %v666_v53 }
 0x111   : > { %v439_v54 = vpop.f32.mrf.mxu0 }
 0x112   : > { %v667_v57 = vmul.f32 %v439_v54, %v439_v54  ;;  %v635_v61 = vadd.f32 %v634_v56, %v439_v54 }
 0x113   : > { %v1026_v59 = vpop.f32.mrf.mxu0 }
 0x114   : > { %v692_v63 = vadd.f32 %v691_v60, %v667_v57 }
 0x115   : > { %v442_v62 = vpop.f32.mrf.mxu0 }
 0x116   : > { %v928_v0 = vpack.c.bf16 %v442_v62, %v439_v54  ;;  %v636_v1 = vadd.f32 %v635_v61, %v442_v62  ;;  %v668_v2 = vmul.f32 %v442_v62, %v442_v62 }
 0x117   : > { %v1027_v3 = vpop.f32.mrf.mxu0 }
 0x118   : > { %965 = vst [vmem:[%s1225_s4 + $0x30] sm:$0xff] %v928_v0   ;;  %v637_v5 = vadd.f32 %v636_v1, %v1218_v21  ;;  %v693_v7 = vadd.f32 %v692_v63, %v668_v2  ;;  %v673_v21 = vmul.f32 %v1241_v41, %v1241_v41 }
 0x11a   : > { %v638_v9 = vadd.f32 %v637_v5, %v1227_v25  ;;  %v694_v10 = vadd.f32 %v693_v7, %v669_v4  ;;  %v674_v25 = vmul.f32 %v1243_v45, %v1243_v45 }
 0x11c   : > { %v639_v12 = vadd.f32 %v638_v9, %v1233_v31  ;;  %v695_v13 = vadd.f32 %v694_v10, %v670_v8  ;;  %v675_v31 = vmul.f32 %v1249_v51, %v1249_v51 }
 0x11e   : > { %v696_v15 = vadd.f32 %v695_v13, %v671_v11  ;;  %v640_v17 = vadd.f32 %v639_v12, %v1235_v35 }
 0x120   : > { %v641_v18 = vadd.f32 %v640_v17, %v1241_v41  ;;  %v697_v19 = vadd.f32 %v696_v15, %v672_v14 }
 0x122   : > { %v642_v20 = vadd.f32 %v641_v18, %v1243_v45  ;;  %v698_v22 = vadd.f32 %v697_v19, %v673_v21  ;;  %v677_v45 = vmul.f32 %v1257_v6, %v1257_v6 }
 0x124   : > { %v643_v23 = vadd.f32 %v642_v20, %v1249_v51  ;;  %v699_v24 = vadd.f32 %v698_v22, %v674_v25  ;;  %v678_v51 = vmul.f32 %v1259_v16, %v1259_v16 }
 0x126   : > { %v644_v35 = vadd.f32 %v643_v23, %v1251_v58  ;;  %v700_v41 = vadd.f32 %v699_v24, %v675_v31  ;;  %v679_v58 = vmul.f32 %v1265_v30, %v1265_v30 }
 0x128   : > { %v701_v27 = vadd.f32 %v700_v41, %v676_v26  ;;  %v645_v28 = vadd.f32 %v644_v35, %v1257_v6 }
 0x12a   : > { %v702_v29 = vadd.f32 %v701_v27, %v677_v45  ;;  %v646_v32 = vadd.f32 %v645_v28, %v1259_v16 }
 0x12c   : > { %v703_v33 = vadd.f32 %v702_v29, %v678_v51  ;;  %v647_v34 = vadd.f32 %v646_v32, %v1265_v30 }
 0x12e   : > { %v704_v36 = vadd.f32 %v703_v33, %v679_v58  ;;  %v648_v37 = vadd.f32 %v647_v34, %v490_v42 }
 0x130   : > { %v649_v39 = vrot.slane %v648_v37, 4  ;;  %v705_v40 = vadd.f32 %v704_v36, %v680_v38 }
 0x132   : > { %v650_v6 = vadd.f32 %v649_v39, %v648_v37  ;;  %v706_v43 = vrot.slane %v705_v40, 4 }
 0x134   : > { %v651_v44 = vrot.slane %v650_v6, 2  ;;  %v707_v46 = vadd.f32 %v706_v43, %v705_v40 }
 0x136   : > { %v652_v47 = vadd.f32 %v651_v44, %v650_v6  ;;  %v708_v48 = vrot.slane %v707_v46, 2 }
 0x138   : > { %v653_v16 = vrot.slane %v652_v47, 1  ;;  %v709_v49 = vadd.f32 %v708_v48, %v707_v46 }
 0x13a   : > { %v710_v50 = vrot.slane %v709_v49, 1  ;;  %v654_v30 = vadd.f32 %v653_v16, %v652_v47 }
 0x13c   : > { %v711_v42 = vadd.f32 %v710_v50, %v709_v49 }
 0x13e   : > { %v713_v52 = vsel %vm712_vm3, %v654_v30, %v711_v42 }
 0x13f   : > { %714 = vst [vmem:[%s184_s8] sm:$0x3] %v713_v52 }
 0x140 PF: > { %s14_s12 = sadd.s32 1, %s1096_s12  }
 0x141   : > { %p11_p5 = scmp.ge.s32.totalorder %s14_s12, 4  }
 0x143   :  { %13 = sbr.rel (!%p11_p5) target bundleno = 1 (0x1), region = 70 }

// kernel: decoder_block_forward.3
= control target key start
LH: loop header
LB: loop body
LE: loop exit
PB: predicated region body
PF: predicated region fallthrough
CT: control target
= control target key end

     0   :  { %s3168_s18 = smov 0   ;;  %s4033_s0 = inlined_call_operand.vmem [shape: bf16[288,1152], index: 0, kind: input, shape index: {}]   ;;  %s4034_s1 = inlined_call_operand.vmem [shape: f32[1,1152], index: 1, kind: input, shape index: {}]   ;;  %s4035_s2 = inlined_call_operand.vmem [shape: f32[1,1152], index: 2, kind: input, shape index: {}]   ;;  %s4036_s3 = inlined_call_operand.vmem [shape: bf16[1152,128], index: 3, kind: input, shape index: {}]   ;;  %s4037_s4 = inlined_call_operand.vmem [shape: bf16[288,128], index: 4, kind: output, shape index: {0}]   ;;  %s4038_s5 = inlined_call_operand.vmem [shape: f32[2,2,128], index: 5, kind: output, shape index: {1}]  }
   0x1 LB: > { %s3174_s19 = sadd.s32 4294967295, %s3134_s18   ;;  %p2509_p0 = scmp.ge.s32.totalorder %s3134_s18, 1  ;;  %s3134_s18 = sphi %s3168_s18, %s16_s18  }
   0x2   : > { %p192_p1 = scmp.lt.s32.totalorder %s3134_s18, 3 }
   0x4   : > { %p193_p2 = pnand %p2509_p0, %p192_p1 }
   0x5   : > { %s225_s22 = smul.u32 (!%p193_p2), 18, %s3174_s19  ;;  %p238_p4 = scmp.lt.s32.totalorder (!%p193_p2), %s3174_s19, 1 }
   0x6   : > { %196 = sbr.rel (%p193_p2) target bundleno = 445 (0x1bd), region = 36 }
   0x7   : > { %p226_p3 = scmp.lt.s32.totalorder (!%p193_p2), %s225_s22, 35 }
   0xb   : > { %v3054_v0 = vld [vmem:[%s4036_s3 + $0x78] sm:$0xff]   ;;  %v3056_v2 = vld [vmem:[%s4036_s3 + $0x70] sm:$0xff]   ;;  %v3058_v4 = vld [vmem:[%s4036_s3 + $0x68] sm:$0xff]   ;;  %s4040_s22 = smov (!%p226_p3, %s225_s22), 35  ;;  %v499_v5 = vlaneseq  ;;  %vm3137_vm0 = vmmov 0   ;;  %s4042_s19 = smov (!%p238_p4, %s3174_s19), 1 }
   0xc   : > { %v3055_v1 = vld [vmem:[%s4036_s3 + $0x38] sm:$0xff]   ;;  %3027 = vmatprep.subr.bf16.mxu1 %v3054_v0  ;;  %2678 = vmatprep.subr.bf16.mxu0 %v3054_v0  ;;  %v3057_v3 = vld [vmem:[%s4036_s3 + $0x30] sm:$0xff]   ;;  %v3059_v6 = vld [vmem:[%s4036_s3 + $0x28] sm:$0xff]   ;;  %s3043_s10 = smul.u32 36, %s4040_s22  ;;  %vm2415_vm1 = vcmask 1040384  }
   0xd   : > { %3035 = vmatpush3.bf16.msra.mxu1 %v3055_v1  ;;  %2679 = vmatpush3.bf16.msra.mxu0 %v3055_v1  ;;  %v3060_v7 = vld [vmem:[%s4036_s3 + $0x60] sm:$0xff]   ;;  %v3203_v8 = vshrl.u32 %v499_v5, 7  ;;  %v3062_v10 = vld [vmem:[%s4036_s3 + $0x58] sm:$0xff]   ;;  %v3064_v15 = vld [vmem:[%s4036_s3 + $0x50] sm:$0xff]  }
   0xe   : > { %3028 = vmatprep.subr.bf16.mxu1 %v3056_v2  ;;  %2680 = vmatprep.subr.bf16.mxu0 %v3056_v2  ;;  %v3061_v9 = vld [vmem:[%s4036_s3 + $0x20] sm:$0xff]   ;;  %s3214_s17 = scalar_lea.vmem %s4033_s0, %s3043_s10  ;;  %v3063_v13 = vld [vmem:[%s4036_s3 + $0x18] sm:$0xff]   ;;  %v3065_v31 = vld [vmem:[%s4036_s3 + $0x10] sm:$0xff]  }
   0xf   : > { %v505_v11 = vsub.s32 1, %v3203_v8  ;;  %v501_v12 = vsub.s32 0, %v3203_v8  ;;  %v509_v14 = vsub.s32 2, %v3203_v8  ;;  %v513_v16 = vsub.s32 3, %v3203_v8  ;;  %v283_v17 = vld [vmem:[%s3214_s17 + $0x120] sm:$0xff]  ;;  %v3066_v36 = vld [vmem:[%s4036_s3 + $0x48] sm:$0xff]  }
  0x10   : > { %v288_v18 = vld [vmem:[%s3214_s17 + $0x144] sm:$0xff]  ;;  %v517_v20 = vsub.s32 4, %v3203_v8  ;;  %v521_v21 = vsub.s32 5, %v3203_v8  ;;  %v405_v22 = vunpack.c.l.bf16 %v283_v17  ;;  %v406_v23 = vunpack.c.h.bf16 %v283_v17  ;;  %v298_v43 = vld [vmem:[%s3214_s17 + $0x18c] sm:$0xff] }
  0x11   : > { %3036 = vmatpush3.bf16.msra.mxu1 %v3057_v3  ;;  %2681 = vmatpush3.bf16.msra.mxu0 %v3057_v3  ;;  %v495_v19 = vld [vmem:[%s4034_s1] sm:$0xff]  ;;  %v414_v24 = vunpack.c.l.bf16 %v288_v18  ;;  %v415_v25 = vunpack.c.h.bf16 %v288_v18  ;;  %v529_v35 = vsub.s32 7, %v3203_v8  ;;  %v525_v40 = vsub.s32 6, %v3203_v8  ;;  %v293_v42 = vld [vmem:[%s3214_s17 + $0x168] sm:$0xff]  ;;  %v3074_v18 = vld [vmem:[%s4036_s3 + $0x178] sm:$0xff]  }
  0x12   : > { %3029 = vmatprep.subr.bf16.mxu1 %v3058_v4  ;;  %2682 = vmatprep.subr.bf16.mxu0 %v3058_v4  ;;  %v3236_v26 = vld [vmem:[%s4035_s2] sm:$0xff]  ;;  %v3238_v27 = vrot.slane %v495_v19, %v505_v11  ;;  %v3243_v29 = vrot.slane %v495_v19, %v501_v12  ;;  %v3251_v32 = vrot.slane %v495_v19, %v509_v14  ;;  %v424_v50 = vunpack.c.h.bf16 %v293_v42  ;;  %v3067_v53 = vld [vmem:[%s4036_s3 + $0x8] sm:$0xff]  }
  0x13   : > { %v3241_v28 = vrot.slane %v3236_v26, %v505_v11  ;;  %v3246_v30 = vrot.slane %v3236_v26, %v501_v12  ;;  %v3253_v33 = vrot.slane %v495_v19, %v513_v16  ;;  %v3256_v34 = vrot.slane %v3236_v26, %v513_v16  ;;  %v243_v51 = vld [vmem:[%s3214_s17] sm:$0xff] }
  0x14   : > { %v617_v37 = vmul.f32 %v3238_v27, %v406_v23  ;;  %v626_v38 = vmul.f32 %v3238_v27, %v415_v25  ;;  %v616_v39 = vmul.f32 %v3243_v29, %v405_v22  ;;  %v625_v41 = vmul.f32 %v3243_v29, %v414_v24  ;;  %v248_v52 = vld [vmem:[%s3214_s17 + $0x24] sm:$0xff]  ;;  %v303_v25 = vld [vmem:[%s3214_s17 + $0x1b0] sm:$0xff] }
  0x15   : > { %3037 = vmatpush3.bf16.msra.mxu1 %v3059_v6  ;;  %2683 = vmatpush3.bf16.msra.mxu0 %v3059_v6  ;;  %v3270_v44 = vrot.slane %v3236_v26, %v509_v14  ;;  %v3274_v45 = vrot.slane %v495_v19, %v517_v20  ;;  %v3278_v46 = vrot.slane %v495_v19, %v521_v21  ;;  %v433_v55 = vunpack.c.h.bf16 %v298_v43  ;;  %v3068_v58 = vld [vmem:[%s4036_s3 + $0x40] sm:$0xff]  }
  0x16   : > { %3030 = vmatprep.subr.bf16.mxu1 %v3060_v7  ;;  %2684 = vmatprep.subr.bf16.mxu0 %v3060_v7  ;;  %v828_v47 = vadd.f32 %v3241_v28, %v617_v37  ;;  %v837_v48 = vadd.f32 %v3241_v28, %v626_v38  ;;  %v827_v49 = vadd.f32 %v3246_v30, %v616_v39  ;;  %v333_v56 = vunpack.c.l.bf16 %v243_v51  ;;  %v3069_v3 = vld [vmem:[%s4036_s3] sm:$0xff]  }
  0x17   : > { %v836_v54 = vadd.f32 %v3246_v30, %v625_v41  ;;  %v334_v57 = vunpack.c.h.bf16 %v243_v51  ;;  %v635_v62 = vmul.f32 %v3238_v27, %v424_v50  ;;  %v644_v0 = vmul.f32 %v3238_v27, %v433_v55  ;;  %v258_v50 = vld [vmem:[%s3214_s17 + $0x6c] sm:$0xff] }
  0x18   : > { %v990_v59 = vmax.f32 %v828_v47, 0.0  ;;  %v999_v60 = vmax.f32 %v837_v48, 0.0  ;;  %v989_v61 = vmax.f32 %v827_v49, 0.0  ;;  %v342_v1 = vunpack.c.l.bf16 %v248_v52  ;;  %v3072_v51 = vld [vmem:[%s4036_s3 + $0xf0] sm:$0xff]  }
  0x19   : > { %3038 = vmatpush3.bf16.msra.mxu1 %v3061_v9  ;;  %2685 = vmatpush3.bf16.msra.mxu0 %v3061_v9  ;;  %v998_v63 = vmax.f32 %v836_v54, 0.0  ;;  %v343_v2 = vunpack.c.h.bf16 %v248_v52  ;;  %v846_v5 = vadd.f32 %v3241_v28, %v635_v62  ;;  %v545_v6 = vmul.f32 %v3238_v27, %v334_v57 }
  0x1a   : > { %3031 = vmatprep.subr.bf16.mxu1 %v3062_v10  ;;  %2686 = vmatprep.subr.bf16.mxu0 %v3062_v10  ;;  %v1116_v4 = vpack.c.bf16 %v999_v60, %v990_v59  ;;  %v423_v7 = vunpack.c.l.bf16 %v293_v42  ;;  %v3070_v10 = vld [vmem:[%s4036_s3 + $0xf8] sm:$0xff]   ;;  %v855_v11 = vadd.f32 %v3241_v28, %v644_v0  ;;  %v544_v17 = vmul.f32 %v3243_v29, %v333_v56  ;;  %v253_v42 = vld [vmem:[%s3214_s17 + $0x48] sm:$0xff]  ;;  %v3073_v56 = vld [vmem:[%s4036_s3 + $0xb0] sm:$0xff]  }
  0x1b   : > { %v1115_v9 = vpack.c.bf16 %v998_v63, %v989_v61  ;;  %v554_v12 = vmul.f32 %v3238_v27, %v343_v2  ;;  %v1008_v14 = vmax.f32 %v846_v5, 0.0  ;;  %v553_v24 = vmul.f32 %v3243_v29, %v342_v1  ;;  %v3076_v61 = vld [vmem:[%s4036_s3 + $0x138] sm:$0xff]  }
  0x1c   : > { %1800 = vmatprep.mubr.bf16.mxu1 %v1116_v4  ;;  %v634_v16 = vmul.f32 %v3243_v29, %v423_v7  ;;  %v1017_v19 = vmax.f32 %v855_v11, 0.0  ;;  %v755_v39 = vadd.f32 %v3246_v30, %v544_v17  ;;  %v442_v41 = vunpack.c.h.bf16 %v303_v25  ;;  %v3078_v4 = vld [vmem:[%s4036_s3 + $0x170] sm:$0xff]   ;;  %v3075_v7 = vld [vmem:[%s4036_s3 + $0xe8] sm:$0xff]  }
  0x1d   : > { %3039 = vmatpush3.bf16.msra.mxu1 %v3063_v13  ;;  %2687 = vmatpush3.bf16.msra.mxu0 %v3063_v13  ;;  %v432_v13 = vunpack.c.l.bf16 %v298_v43  ;;  %v765_v22 = vadd.f32 %v3241_v28, %v554_v12  ;;  %v764_v49 = vadd.f32 %v3246_v30, %v553_v24  ;;  %v352_v60 = vunpack.c.h.bf16 %v253_v42 }
  0x1e   : > { %3032 = vmatprep.subr.bf16.mxu1 %v3064_v15  ;;  %2688 = vmatprep.subr.bf16.mxu0 %v3064_v15  ;;  %v756_v15 = vadd.f32 %v3241_v28, %v545_v6  ;;  %v845_v38 = vadd.f32 %v3246_v30, %v634_v16  ;;  %v1125_v43 = vpack.c.bf16 %v1017_v19, %v1008_v14  ;;  %v361_v0 = vunpack.c.h.bf16 %v258_v50  ;;  %v3079_v14 = vld [vmem:[%s4036_s3 + $0x130] sm:$0xff]  }
  0x1f   : > { %v643_v23 = vmul.f32 %v3243_v29, %v432_v13  ;;  %v927_v47 = vmax.f32 %v765_v22, 0.0  ;;  %v653_v55 = vmul.f32 %v3238_v27, %v442_v41  ;;  %v926_v59 = vmax.f32 %v764_v49, 0.0  ;;  %v3077_v13 = vld [vmem:[%s4036_s3 + $0xa8] sm:$0xff]   ;;  %v3080_v22 = vld [vmem:[%s4036_s3 + $0xe0] sm:$0xff]  }
  0x20   : > { %v918_v37 = vmax.f32 %v756_v15, 0.0  ;;  %v1007_v52 = vmax.f32 %v845_v38, 0.0  ;;  %v441_v1 = vunpack.c.l.bf16 %v303_v25  ;;  %v563_v5 = vmul.f32 %v3238_v27, %v352_v60  ;;  %v313_v25 = vld [vmem:[%s3214_s17 + $0x1f8] sm:$0xff] }
  0x21   : > { %3040 = vmatpush3.bf16.msra.mxu1 %v3065_v31  ;;  %2689 = vmatpush3.bf16.msra.mxu0 %v3065_v31  ;;  %v308_v31 = vld [vmem:[%s3214_s17 + $0x1d4] sm:$0xff]  ;;  %v854_v48 = vadd.f32 %v3246_v30, %v643_v23  ;;  %v864_v63 = vadd.f32 %v3241_v28, %v653_v55  ;;  %v572_v11 = vmul.f32 %v3238_v27, %v361_v0  ;;  %v351_v17 = vunpack.c.l.bf16 %v253_v42  ;;  %v318_v41 = vld [vmem:[%s3214_s17 + $0x21c] sm:$0xff] }
  0x22   : > { %3033 = vmatprep.subr.bf16.mxu1 %v3066_v36  ;;  %2690 = vmatprep.subr.bf16.mxu0 %v3066_v36  ;;  %v3071_v36 = vld [vmem:[%s4036_s3 + $0xb8] sm:$0xff]   ;;  %v451_v54 = vunpack.c.h.bf16 %v308_v31  ;;  %v1080_v57 = vpack.c.bf16 %v927_v47, %v918_v37  ;;  %v450_v6 = vunpack.c.l.bf16 %v308_v31  ;;  %v652_v12 = vmul.f32 %v3243_v29, %v441_v1  ;;  %v263_v42 = vld [vmem:[%s3214_s17 + $0x90] sm:$0xff]  ;;  %v3086_v1 = vld [vmem:[%s4036_s3 + $0x160] sm:$0xff]  }
  0x23   : > { %v774_v15 = vadd.f32 %v3241_v28, %v563_v5  ;;  %v783_v23 = vadd.f32 %v3241_v28, %v572_v11  ;;  %v3363_v31 = vrot.slane %v3236_v26, %v521_v21  ;;  %v562_v38 = vmul.f32 %v3243_v29, %v351_v17  ;;  %v3084_v0 = vld [vmem:[%s4036_s3 + $0xd8] sm:$0xff]  }
  0x24   : > { %v662_v62 = vmul.f32 %v3238_v27, %v451_v54  ;;  %1768 = vmatprep.mubr.bf16.mxu0 %v1080_v57  ;;  %v661_v16 = vmul.f32 %v3243_v29, %v450_v6  ;;  %v863_v24 = vadd.f32 %v3246_v30, %v652_v12  ;;  %v3082_v54 = vld [vmem:[%s4036_s3 + $0x168] sm:$0xff]   ;;  %v469_v55 = vunpack.c.h.bf16 %v318_v41 }
  0x25   : > { %3041 = vmatpush3.bf16.msra.mxu1 %v3067_v53  ;;  %2691 = vmatpush3.bf16.msra.mxu0 %v3067_v53  ;;  %v917_v53 = vmax.f32 %v755_v39, 0.0  ;;  %v3083_v57 = vld [vmem:[%s4036_s3 + $0x128] sm:$0xff]   ;;  %v459_v6 = vunpack.c.l.bf16 %v313_v25  ;;  %v468_v12 = vunpack.c.l.bf16 %v318_v41 }
  0x26   : > { %3034 = vmatprep.subr.bf16.mxu1 %v3068_v58  ;;  %2692 = vmatprep.subr.bf16.mxu0 %v3068_v58  ;;  %v1016_v58 = vmax.f32 %v854_v48, 0.0  ;;  %v872_v37 = vadd.f32 %v3246_v30, %v661_v16  ;;  %v945_v48 = vmax.f32 %v783_v23, 0.0  ;;  %v1025_v49 = vmax.f32 %v863_v24, 0.0 }
  0x27   : > { %v670_v17 = vmul.f32 %v3243_v29, %v459_v6 }
  0x28   : > { %v1124_v2 = vpack.c.bf16 %v1016_v58, %v1007_v52  ;;  %v1034_v21 = vmax.f32 %v872_v37, 0.0  ;;  %v773_v52 = vadd.f32 %v3246_v30, %v562_v38  ;;  %v328_v37 = vld [vmem:[%s3214_s17 + $0x264] sm:$0xff] }
  0x29   : > { %3042 = vmatpush3.bf16.msra.mxu1 %v3069_v3  ;;  %2693 = vmatpush3.bf16.msra.mxu0 %v3069_v3  ;;  %v1079_v3 = vpack.c.bf16 %v926_v59, %v917_v53  ;;  %v370_v59 = vunpack.c.h.bf16 %v263_v42  ;;  %v881_v41 = vadd.f32 %v3246_v30, %v670_v17 }
  0x2a   : > { %2748 = vmatprep.subr.bf16.mxu1 %v3070_v10  ;;  %2818 = vmatprep.subr.bf16.mxu0 %v3074_v18  ;;  %v1026_v10 = vmax.f32 %v864_v63, 0.0  ;;  %v360_v18 = vunpack.c.l.bf16 %v258_v50  ;;  %v460_v50 = vunpack.c.h.bf16 %v313_v25  ;;  %v3089_v25 = vld [vmem:[%s4036_s3 + $0x158] sm:$0xff]  }
  0x2c   : > { %1801 = vmatmul.mubr.bf16.vlgmr.msra.gmra.mxu1 %v1115_v9  ;;  %v873_v9 = vadd.f32 %v3241_v28, %v662_v62  ;;  %1769 = vmatmul.mubr.bf16.vlgmr.msra.gmra.mxu0 %v1079_v3  ;;  %v571_v39 = vmul.f32 %v3243_v29, %v360_v18  ;;  %v671_v58 = vmul.f32 %v3238_v27, %v460_v50  ;;  %v935_v62 = vmax.f32 %v773_v52, 0.0  ;;  %v3088_v18 = vld [vmem:[%s4036_s3 + $0xd0] sm:$0xff]   ;;  %v278_v52 = vld [vmem:[%s3214_s17 + $0xfc] sm:$0xff] }
  0x2d   : > { %2749 = vmatpush3.bf16.msra.mxu1 %v3071_v36  ;;  %1808 = vmatprep.mubr.bf16.mxu1 %v1125_v43  ;;  %v936_v36 = vmax.f32 %v774_v15, 0.0  ;;  %v3371_v43 = vld [vmem:[%s3214_s17 + $0xb4] sm:$0xff] }
  0x2e   : > { %2750 = vmatprep.subr.bf16.mxu1 %v3072_v51  ;;  %2819 = vmatpush3.bf16.msra.mxu0 %v3076_v61  ;;  %v1035_v19 = vmax.f32 %v873_v9, 0.0  ;;  %v3081_v51 = vld [vmem:[%s4036_s3 + $0xa0] sm:$0xff]   ;;  %v782_v53 = vadd.f32 %v3246_v30, %v571_v39  ;;  %v379_v60 = vunpack.c.h.bf16 %v3371_v43  ;;  %v1133_v61 = vpack.c.bf16 %v1034_v21, %v1025_v49  ;;  %v3085_v9 = vld [vmem:[%s4036_s3 + $0x98] sm:$0xff]   ;;  %v3090_v50 = vld [vmem:[%s4036_s3 + $0x90] sm:$0xff]  }
  0x2f   : > { %2820 = vmatprep.subr.bf16.mxu0 %v3078_v4  ;;  %v882_v3 = vadd.f32 %v3241_v28, %v671_v58  ;;  %v581_v4 = vmul.f32 %v3238_v27, %v370_v59  ;;  %v378_v23 = vunpack.c.l.bf16 %v3371_v43  ;;  %v3091_v21 = vld [vmem:[%s4036_s3 + $0x118] sm:$0xff]  }
  0x30   : > { %v1134_v47 = vpack.c.bf16 %v1035_v19, %v1026_v10  ;;  %v944_v63 = vmax.f32 %v782_v53, 0.0  ;;  %v590_v5 = vmul.f32 %v3238_v27, %v379_v60  ;;  %v3087_v10 = vld [vmem:[%s4036_s3 + $0x120] sm:$0xff]  }
  0x31   : > { %2751 = vmatpush3.bf16.msra.mxu1 %v3073_v56  ;;  %v1089_v56 = vpack.c.bf16 %v945_v48, %v936_v36  ;;  %v792_v15 = vadd.f32 %v3241_v28, %v581_v4  ;;  %v323_v36 = vld [vmem:[%s3214_s17 + $0x240] sm:$0xff]  ;;  %v589_v48 = vmul.f32 %v3243_v29, %v378_v23  ;;  %v396_v23 = vunpack.c.l.bf16 %v278_v52 }
  0x32   : > { %2752 = vmatprep.subr.bf16.mxu1 %v3075_v7  ;;  %2821 = vmatpush3.bf16.msra.mxu0 %v3079_v14  ;;  %v1088_v7 = vpack.c.bf16 %v944_v63, %v935_v62  ;;  %v1044_v14 = vmax.f32 %v882_v3, 0.0  ;;  %v801_v16 = vadd.f32 %v3241_v28, %v590_v5  ;;  %v3094_v5 = vld [vmem:[%s4036_s3 + $0x110] sm:$0xff]  }
  0x33   : > { %1776 = vmatprep.mubr.bf16.mxu0 %v1089_v56  ;;  %2822 = vmatprep.subr.bf16.mxu0 %v3082_v54  ;;  %v954_v38 = vmax.f32 %v792_v15, 0.0  ;;  %v1043_v54 = vmax.f32 %v881_v41, 0.0  ;;  %v487_v56 = vunpack.c.h.bf16 %v328_v37  ;;  %v800_v59 = vadd.f32 %v3246_v30, %v589_v48  ;;  %v3099_v41 = vld [vmem:[%s4036_s3 + $0x80] sm:$0xff]  }
  0x34   : > { %1809 = vmatmul.mubr.bf16.gmra.mxu1 %v1124_v2  ;;  %v680_v2 = vmul.f32 %v3238_v27, %v469_v55  ;;  %1777 = vmatmul.mubr.bf16.gmra.mxu0 %v1088_v7  ;;  %v963_v39 = vmax.f32 %v801_v16, 0.0  ;;  %v3092_v55 = vld [vmem:[%s4036_s3 + $0x150] sm:$0xff]   ;;  %v486_v7 = vunpack.c.l.bf16 %v328_v37 }
  0x35   : > { %2753 = vmatpush3.bf16.msra.mxu1 %v3077_v13  ;;  %1816 = vmatprep.mubr.bf16.mxu1 %v1134_v47  ;;  %v369_v13 = vunpack.c.l.bf16 %v263_v42  ;;  %v478_v42 = vunpack.c.h.bf16 %v323_v36  ;;  %v698_v63 = vmul.f32 %v3238_v27, %v487_v56  ;;  %v962_v4 = vmax.f32 %v800_v59, 0.0  ;;  %v3102_v59 = vld [vmem:[%s4036_s3 + $0x1f8] sm:$0xff]  }
  0x36   : > { %2754 = vmatprep.subr.bf16.mxu1 %v3080_v22  ;;  %v891_v11 = vadd.f32 %v3241_v28, %v680_v2  ;;  %2823 = vmatpush3.bf16.msra.mxu0 %v3083_v57  ;;  %v679_v22 = vmul.f32 %v3243_v29, %v468_v12  ;;  %v1098_v53 = vpack.c.bf16 %v963_v39, %v954_v38  ;;  %v477_v2 = vunpack.c.l.bf16 %v323_v36  ;;  %v249_v36 = vld [vmem:[%s3214_s17 + $0x2c] sm:$0xff] }
  0x37   : > { %v580_v24 = vmul.f32 %v3243_v29, %v369_v13  ;;  %2824 = vmatprep.subr.bf16.mxu0 %v3086_v1  ;;  %v689_v57 = vmul.f32 %v3238_v27, %v478_v42  ;;  %v397_v1 = vunpack.c.h.bf16 %v278_v52  ;;  %v697_v16 = vmul.f32 %v3243_v29, %v486_v7 }
  0x38   : > { %v1053_v19 = vmax.f32 %v891_v11, 0.0  ;;  %v890_v43 = vadd.f32 %v3246_v30, %v679_v22  ;;  %1784 = vmatprep.mubr.bf16.mxu0 %v1098_v53  ;;  %v3095_v11 = vld [vmem:[%s4036_s3 + $0x88] sm:$0xff]   ;;  %v688_v13 = vmul.f32 %v3243_v29, %v477_v2 }
  0x39   : > { %2755 = vmatpush3.bf16.msra.mxu1 %v3081_v51  ;;  %v791_v49 = vadd.f32 %v3246_v30, %v580_v24  ;;  %v273_v51 = vld [vmem:[%s3214_s17 + $0xd8] sm:$0xff]  ;;  %v608_v12 = vmul.f32 %v3238_v27, %v397_v1  ;;  %v3098_v24 = vld [vmem:[%s4036_s3 + $0xc0] sm:$0xff]   ;;  %v908_v38 = vadd.f32 %v3246_v30, %v697_v16 }
  0x3a   : > { %2756 = vmatprep.subr.bf16.mxu1 %v3084_v0  ;;  %v1143_v47 = vpack.c.bf16 %v1053_v19, %v1044_v14  ;;  %2825 = vmatpush3.bf16.msra.mxu0 %v3087_v10  ;;  %v1052_v58 = vmax.f32 %v890_v43, 0.0  ;;  %v388_v62 = vunpack.c.h.bf16 %v273_v51  ;;  %v900_v0 = vadd.f32 %v3241_v28, %v689_v57 }
  0x3b   : > { %v953_v60 = vmax.f32 %v791_v49, 0.0  ;;  %2826 = vmatprep.subr.bf16.mxu0 %v3089_v25  ;;  %v387_v17 = vunpack.c.l.bf16 %v273_v51  ;;  %v819_v22 = vadd.f32 %v3241_v28, %v608_v12  ;;  %v244_v25 = vld [vmem:[%s3214_s17 + $0x8] sm:$0xff]  ;;  %v607_v49 = vmul.f32 %v3243_v29, %v396_v23 }
  0x3c   : > { %1817 = vmatmul.mubr.bf16.gmra.mxu1 %v1133_v61  ;;  %v3093_v61 = vld [vmem:[%s4036_s3 + $0xc8] sm:$0xff]   ;;  %v1142_v3 = vpack.c.bf16 %v1052_v58, %v1043_v54  ;;  %v599_v6 = vmul.f32 %v3238_v27, %v388_v62  ;;  %v1062_v10 = vmax.f32 %v900_v0, 0.0  ;;  %v899_v27 = vadd.f32 %v3246_v30, %v688_v13  ;;  %v254_v13 = vld [vmem:[%s3214_s17 + $0x50] sm:$0xff] }
  0x3d   : > { %2757 = vmatpush3.bf16.msra.mxu1 %v3085_v9  ;;  %1824 = vmatprep.mubr.bf16.mxu1 %v1143_v47  ;;  %v909_v9 = vadd.f32 %v3241_v28, %v698_v63  ;;  %v1097_v14 = vpack.c.bf16 %v962_v4, %v953_v60  ;;  %v598_v39 = vmul.f32 %v3243_v29, %v387_v17  ;;  %v335_v42 = vunpack.c.l.bf16 %v244_v25 }
  0x3e   : > { %2758 = vmatprep.subr.bf16.mxu1 %v3088_v18  ;;  %2827 = vmatpush3.bf16.msra.mxu0 %v3091_v21  ;;  %v810_v15 = vadd.f32 %v3241_v28, %v599_v6  ;;  %v3096_v18 = vld [vmem:[%s4036_s3 + $0x148] sm:$0xff]   ;;  %v981_v43 = vmax.f32 %v819_v22, 0.0  ;;  %v1061_v48 = vmax.f32 %v899_v27, 0.0  ;;  %v245_v21 = vld [vmem:[%s3214_s17 + $0x10] sm:$0xff]  ;;  %v1070_v51 = vmax.f32 %v908_v38, 0.0 }
  0x3f   : > { %2828 = vmatprep.subr.bf16.mxu0 %v3092_v55  ;;  %v1071_v19 = vmax.f32 %v909_v9, 0.0  ;;  %1785 = vmatmul.mubr.bf16.gmra.mxu0 %v1097_v14  ;;  %v3097_v28 = vld [vmem:[%s4036_s3 + $0x108] sm:$0xff]   ;;  %v809_v52 = vadd.f32 %v3246_v30, %v598_v39  ;;  %v336_v53 = vunpack.c.h.bf16 %v244_v25  ;;  %v344_v54 = vunpack.c.l.bf16 %v249_v36  ;;  %v250_v55 = vld [vmem:[%s3214_s17 + $0x34] sm:$0xff] }
  0x40   : > { %v972_v37 = vmax.f32 %v810_v15, 0.0  ;;  %v818_v57 = vadd.f32 %v3246_v30, %v607_v49  ;;  %v345_v58 = vunpack.c.h.bf16 %v249_v36  ;;  %v546_v29 = vmul.f32 %v3251_v32, %v335_v42  ;;  %v259_v14 = vld [vmem:[%s3214_s17 + $0x74] sm:$0xff] }
  0x41   : > { %2759 = vmatpush3.bf16.msra.mxu1 %v3090_v50  ;;  %v1152_v47 = vpack.c.bf16 %v1071_v19, %v1062_v10  ;;  %v3100_v50 = vld [vmem:[%s4036_s3 + $0x140] sm:$0xff]   ;;  %v1151_v60 = vpack.c.bf16 %v1070_v51, %v1061_v48  ;;  %v971_v62 = vmax.f32 %v809_v52, 0.0  ;;  %v555_v63 = vmul.f32 %v3251_v32, %v344_v54 }
  0x42   : > { %2760 = vmatprep.subr.bf16.mxu1 %v3093_v61  ;;  %2829 = vmatpush3.bf16.msra.mxu0 %v3094_v5  ;;  %v1107_v56 = vpack.c.bf16 %v981_v43, %v972_v37  ;;  %v547_v61 = vmul.f32 %v3253_v33, %v336_v53  ;;  %v980_v0 = vmax.f32 %v818_v57, 0.0  ;;  %v556_v30 = vmul.f32 %v3253_v33, %v345_v58  ;;  %v3104_v53 = vld [vmem:[%s4036_s3 + $0x238] sm:$0xff]  }
  0x43   : > { %2830 = vmatprep.subr.bf16.mxu0 %v3096_v18  ;;  %v757_v1 = vadd.f32 %v3270_v44, %v546_v29  ;;  %v337_v2 = vunpack.c.l.bf16 %v245_v21  ;;  %v766_v5 = vadd.f32 %v3270_v44, %v555_v63  ;;  %v338_v6 = vunpack.c.h.bf16 %v245_v21  ;;  %v3105_v29 = vld [vmem:[%s4036_s3 + $0x1f0] sm:$0xff]   ;;  %v264_v63 = vld [vmem:[%s3214_s17 + $0x98] sm:$0xff] }
  0x44   : > { %1825 = vmatmul.mubr.bf16.gmra.mxu1 %v1142_v3  ;;  %1792 = vmatprep.mubr.bf16.mxu0 %v1107_v56  ;;  %v3101_v3 = vld [vmem:[%s4036_s3 + $0x100] sm:$0xff]   ;;  %v758_v4 = vadd.f32 %v3256_v34, %v547_v61  ;;  %v346_v7 = vunpack.c.l.bf16 %v250_v55  ;;  %v1106_v9 = vpack.c.bf16 %v980_v0, %v971_v62  ;;  %v767_v10 = vadd.f32 %v3256_v34, %v556_v30 }
  0x45   : > { %2761 = vmatpush3.bf16.msra.mxu1 %v3095_v11  ;;  %1832 = vmatprep.mubr.bf16.mxu1 %v1152_v47  ;;  %v919_v11 = vmax.f32 %v757_v1, 0.0  ;;  %v347_v12 = vunpack.c.h.bf16 %v250_v55  ;;  %v928_v16 = vmax.f32 %v766_v5, 0.0  ;;  %v548_v17 = vmul.f32 %v3274_v45, %v337_v2  ;;  %v255_v47 = vld [vmem:[%s3214_s17 + $0x58] sm:$0xff] }
  0x46   : > { %2762 = vmatprep.subr.bf16.mxu1 %v3098_v24  ;;  %2831 = vmatpush3.bf16.msra.mxu0 %v3097_v28  ;;  %v920_v15 = vmax.f32 %v758_v4, 0.0  ;;  %v549_v18 = vmul.f32 %v3278_v46, %v338_v6  ;;  %v929_v19 = vmax.f32 %v767_v10, 0.0  ;;  %v557_v22 = vmul.f32 %v3274_v45, %v346_v7 }
  0x47   : > { %2832 = vmatprep.subr.bf16.mxu0 %v3100_v50  ;;  %1793 = vmatmul.mubr.bf16.gmra.mxu0 %v1106_v9  ;;  %v558_v27 = vmul.f32 %v3278_v46, %v347_v12  ;;  %v3500_v23 = vrot.slane %v3236_v26, %v517_v20  ;;  %v1081_v24 = vpack.c.bf16 %v928_v16, %v919_v11  ;;  %v354_v36 = vunpack.c.h.bf16 %v254_v13  ;;  %v3103_v26 = vld [vmem:[%s4036_s3 + $0x1b8] sm:$0xff]  }
  0x48   : > { %v760_v25 = vadd.f32 %v3363_v31, %v549_v18  ;;  %v363_v37 = vunpack.c.h.bf16 %v259_v14  ;;  %v1082_v38 = vpack.c.bf16 %v929_v19, %v920_v15  ;;  %v3136_v42 = vmov 0.0   ;;  %v260_v50 = vld [vmem:[%s3214_s17 + $0x7c] sm:$0xff]  ;;  %v3108_v19 = vld [vmem:[%s4036_s3 + $0x1e8] sm:$0xff]  }
  0x49   : > { %2763 = vmatpush3.bf16.msra.mxu1 %v3099_v41  ;;  %v769_v39 = vadd.f32 %v3363_v31, %v558_v27  ;;  %v759_v28 = vadd.f32 %v3500_v23, %v548_v17  ;;  %v768_v41 = vadd.f32 %v3500_v23, %v557_v22  ;;  %v565_v43 = vmul.f32 %v3253_v33, %v354_v36  ;;  %v269_v9 = vld [vmem:[%s3214_s17 + $0xbc] sm:$0xff] }
  0x4a   : > { %2888 = vmatprep.subr.bf16.mxu1 %v3102_v59  ;;  %2833 = vmatpush3.bf16.msra.mxu0 %v3101_v3  ;;  %v922_v20 = vmax.f32 %v760_v25, 0.0  ;;  %v574_v48 = vmul.f32 %v3253_v33, %v363_v37  ;;  %v353_v49 = vunpack.c.l.bf16 %v254_v13  ;;  %v362_v54 = vunpack.c.l.bf16 %v259_v14  ;;  %v3106_v3 = vld [vmem:[%s4036_s3 + $0x1b0] sm:$0xff]   ;;  %v265_v36 = vld [vmem:[%s3214_s17 + $0xa0] sm:$0xff] }
  0x4b   : > { %2975 = vmatprep.subr.bf16.mxu0 %v3136_v42  ;;  %v931_v21 = vmax.f32 %v769_v39, 0.0  ;;  %v921_v51 = vmax.f32 %v759_v28, 0.0  ;;  %v930_v52 = vmax.f32 %v768_v41, 0.0  ;;  %v776_v55 = vadd.f32 %v3256_v34, %v565_v43  ;;  %v3107_v14 = vld [vmem:[%s4036_s3 + $0x230] sm:$0xff]   ;;  %v270_v41 = vld [vmem:[%s3214_s17 + $0xc4] sm:$0xff] }
  0x4c   : > { %1833 = vmatmul.mubr.bf16.gmra.mxu1 %v1151_v60  ;;  %v785_v56 = vadd.f32 %v3256_v34, %v574_v48  ;;  %v564_v57 = vmul.f32 %v3251_v32, %v353_v49  ;;  %v356_v58 = vunpack.c.h.bf16 %v255_v47  ;;  %v573_v62 = vmul.f32 %v3251_v32, %v362_v54  ;;  %v3109_v48 = vld [vmem:[%s4036_s3 + $0x1a8] sm:$0xff]  }
  0x4d   : > { %1873 = vmatprep.mubr.bf16.mxu1 %v1082_v38  ;;  %v1084_v59 = vpack.c.bf16 %v931_v21, %v922_v20  ;;  %v1083_v60 = vpack.c.bf16 %v930_v52, %v921_v51  ;;  %v365_v61 = vunpack.c.h.bf16 %v260_v50  ;;  %v938_v0 = vmax.f32 %v776_v55, 0.0  ;;  %v274_v52 = vld [vmem:[%s3214_s17 + $0xe0] sm:$0xff] }
  0x4e   : > { %v947_v30 = vmax.f32 %v785_v56, 0.0  ;;  %v775_v1 = vadd.f32 %v3270_v44, %v564_v57  ;;  %v567_v2 = vmul.f32 %v3278_v46, %v356_v58  ;;  %v784_v4 = vadd.f32 %v3270_v44, %v573_v62  ;;  %v3110_v58 = vld [vmem:[%s4036_s3 + $0x228] sm:$0xff]  }
  0x4f   : > { %1978 = vmatprep.mubr.bf16.mxu0 %v1084_v59  ;;  %v576_v5 = vmul.f32 %v3278_v46, %v365_v61  ;;  %v355_v6 = vunpack.c.l.bf16 %v255_v47  ;;  %v364_v7 = vunpack.c.l.bf16 %v260_v50  ;;  %v372_v13 = vunpack.c.h.bf16 %v264_v63  ;;  %v279_v61 = vld [vmem:[%s3214_s17 + $0x104] sm:$0xff] }
  0x50   : > { %1979 = vmatmul.mubr.bf16.vlgmr.msra.gmra.mxu0 %v1083_v60  ;;  %v1091_v10 = vpack.c.bf16 %v947_v30, %v938_v0  ;;  %v937_v11 = vmax.f32 %v775_v1, 0.0  ;;  %v778_v12 = vadd.f32 %v3363_v31, %v567_v2  ;;  %v946_v15 = vmax.f32 %v784_v4, 0.0 }
  0x51   : > { %2976 = vmatpush3.bf16.msra.mxu0 %v3104_v53  ;;  %v787_v16 = vadd.f32 %v3363_v31, %v576_v5  ;;  %v566_v17 = vmul.f32 %v3274_v45, %v355_v6  ;;  %v575_v18 = vmul.f32 %v3274_v45, %v364_v7  ;;  %v381_v27 = vunpack.c.h.bf16 %v269_v9  ;;  %v3111_v53 = vld [vmem:[%s4036_s3 + $0x1e0] sm:$0xff]   ;;  %v3114_v7 = vld [vmem:[%s4036_s3 + $0x1d8] sm:$0xff]  }
  0x52   : > { %v940_v22 = vmax.f32 %v778_v12, 0.0  ;;  %2977 = vmatprep.subr.bf16.mxu0 %v3136_v42  ;;  %v371_v25 = vunpack.c.l.bf16 %v264_v63  ;;  %v1090_v37 = vpack.c.bf16 %v946_v15, %v937_v11  ;;  %v374_v51 = vunpack.c.h.bf16 %v265_v36  ;;  %v3112_v63 = vld [vmem:[%s4036_s3 + $0x1a0] sm:$0xff]  }
  0x53   : > { %v949_v38 = vmax.f32 %v787_v16, 0.0  ;;  %v777_v39 = vadd.f32 %v3500_v23, %v566_v17  ;;  %v786_v28 = vadd.f32 %v3500_v23, %v575_v18  ;;  %v592_v47 = vmul.f32 %v3253_v33, %v381_v27  ;;  %v275_v18 = vld [vmem:[%s3214_s17 + $0xe8] sm:$0xff] }
  0x54   : > { %1874 = vmatmul.mubr.bf16.vlgmr.msra.gmra.mxu1 %v1081_v24  ;;  %v583_v24 = vmul.f32 %v3253_v33, %v372_v13  ;;  %v582_v43 = vmul.f32 %v3251_v32, %v371_v25  ;;  %v383_v59 = vunpack.c.h.bf16 %v270_v41  ;;  %v585_v60 = vmul.f32 %v3278_v46, %v374_v51  ;;  %v3113_v13 = vld [vmem:[%s4036_s3 + $0x220] sm:$0xff]   ;;  %v280_v25 = vld [vmem:[%s3214_s17 + $0x10c] sm:$0xff] }
  0x55   : > { %2889 = vmatpush3.bf16.msra.mxu1 %v3103_v26  ;;  %1881 = vmatprep.mubr.bf16.mxu1 %v1091_v10  ;;  %v380_v26 = vunpack.c.l.bf16 %v269_v9  ;;  %v1093_v49 = vpack.c.bf16 %v949_v38, %v940_v22  ;;  %v939_v50 = vmax.f32 %v777_v39, 0.0  ;;  %v948_v21 = vmax.f32 %v786_v28, 0.0  ;;  %v284_v51 = vld [vmem:[%s3214_s17 + $0x128] sm:$0xff] }
  0x56   : > { %2890 = vmatprep.subr.bf16.mxu1 %v3105_v29  ;;  %v794_v20 = vadd.f32 %v3256_v34, %v583_v24  ;;  %2978 = vmatpush3.bf16.msra.mxu0 %v3107_v14  ;;  %v803_v54 = vadd.f32 %v3256_v34, %v592_v47  ;;  %v793_v57 = vadd.f32 %v3270_v44, %v582_v43  ;;  %v373_v62 = vunpack.c.l.bf16 %v265_v36  ;;  %v3115_v36 = vld [vmem:[%s4036_s3 + $0x198] sm:$0xff]  }
  0x57   : > { %v591_v56 = vmul.f32 %v3251_v32, %v380_v26  ;;  %2979 = vmatprep.subr.bf16.mxu0 %v3136_v42  ;;  %1986 = vmatprep.mubr.bf16.mxu0 %v1093_v49  ;;  %v1092_v29 = vpack.c.bf16 %v948_v21, %v939_v50  ;;  %v382_v2 = vunpack.c.l.bf16 %v270_v41  ;;  %v796_v4 = vadd.f32 %v3363_v31, %v585_v60  ;;  %v3117_v41 = vld [vmem:[%s4036_s3 + $0x1d0] sm:$0xff]  }
  0x58   : > { %v956_v55 = vmax.f32 %v794_v20, 0.0  ;;  %v965_v0 = vmax.f32 %v803_v54, 0.0  ;;  %v955_v1 = vmax.f32 %v793_v57, 0.0  ;;  %v584_v5 = vmul.f32 %v3274_v45, %v373_v62 }
  0x59   : > { %2891 = vmatpush3.bf16.msra.mxu1 %v3106_v3  ;;  %v802_v30 = vadd.f32 %v3270_v44, %v591_v56  ;;  %1987 = vmatmul.mubr.bf16.gmra.mxu0 %v1092_v29  ;;  %v594_v3 = vmul.f32 %v3278_v46, %v383_v59  ;;  %v390_v6 = vunpack.c.h.bf16 %v274_v52  ;;  %v593_v11 = vmul.f32 %v3274_v45, %v382_v2 }
  0x5a   : > { %2892 = vmatprep.subr.bf16.mxu1 %v3108_v19  ;;  %v1100_v9 = vpack.c.bf16 %v965_v0, %v956_v55  ;;  %v399_v12 = vunpack.c.h.bf16 %v279_v61  ;;  %2980 = vmatpush3.bf16.msra.mxu0 %v3110_v58  ;;  %v958_v15 = vmax.f32 %v796_v4, 0.0  ;;  %v795_v16 = vadd.f32 %v3500_v23, %v584_v5  ;;  %v3118_v58 = vld [vmem:[%s4036_s3 + $0x190] sm:$0xff]  }
  0x5b   : > { %v964_v10 = vmax.f32 %v802_v30, 0.0  ;;  %v805_v14 = vadd.f32 %v3363_v31, %v594_v3  ;;  %v601_v17 = vmul.f32 %v3253_v33, %v390_v6  ;;  %2981 = vmatprep.subr.bf16.mxu0 %v3136_v42  ;;  %v804_v22 = vadd.f32 %v3500_v23, %v593_v11  ;;  %v3119_v6 = vld [vmem:[%s4036_s3 + $0x210] sm:$0xff]  }
  0x5c   : > { %1882 = vmatmul.mubr.bf16.gmra.mxu1 %v1090_v37  ;;  %v610_v27 = vmul.f32 %v3253_v33, %v399_v12  ;;  %v389_v24 = vunpack.c.l.bf16 %v274_v52  ;;  %v957_v38 = vmax.f32 %v795_v16, 0.0  ;;  %v398_v28 = vunpack.c.l.bf16 %v279_v61  ;;  %v289_v52 = vld [vmem:[%s3214_s17 + $0x14c] sm:$0xff] }
  0x5d   : > { %2893 = vmatpush3.bf16.msra.mxu1 %v3109_v48  ;;  %1889 = vmatprep.mubr.bf16.mxu1 %v1100_v9  ;;  %v1099_v19 = vpack.c.bf16 %v964_v10, %v955_v1  ;;  %v967_v37 = vmax.f32 %v805_v14, 0.0  ;;  %v812_v39 = vadd.f32 %v3256_v34, %v601_v17  ;;  %v966_v47 = vmax.f32 %v804_v22, 0.0  ;;  %v3120_v61 = vld [vmem:[%s4036_s3 + $0x1c8] sm:$0xff]   ;;  %v285_v12 = vld [vmem:[%s3214_s17 + $0x130] sm:$0xff] }
  0x5e   : > { %2894 = vmatprep.subr.bf16.mxu1 %v3111_v53  ;;  %v821_v20 = vadd.f32 %v3256_v34, %v610_v27  ;;  %v600_v26 = vmul.f32 %v3251_v32, %v389_v24  ;;  %v392_v43 = vunpack.c.h.bf16 %v275_v18  ;;  %2982 = vmatpush3.bf16.msra.mxu0 %v3113_v13  ;;  %v609_v50 = vmul.f32 %v3251_v32, %v398_v28  ;;  %v3116_v53 = vld [vmem:[%s4036_s3 + $0x218] sm:$0xff]   ;;  %v3121_v13 = vld [vmem:[%s4036_s3 + $0x188] sm:$0xff]  }
  0x5f   : > { %v1102_v48 = vpack.c.bf16 %v967_v37, %v958_v15  ;;  %v974_v49 = vmax.f32 %v812_v39, 0.0  ;;  %v401_v21 = vunpack.c.h.bf16 %v280_v25  ;;  %2983 = vmatprep.subr.bf16.mxu0 %v3136_v42  ;;  %v1101_v54 = vpack.c.bf16 %v966_v47, %v957_v38 }
  0x60   : > { %v983_v55 = vmax.f32 %v821_v20, 0.0  ;;  %v811_v56 = vadd.f32 %v3270_v44, %v600_v26  ;;  %v603_v57 = vmul.f32 %v3278_v46, %v392_v43  ;;  %v820_v29 = vadd.f32 %v3270_v44, %v609_v50  ;;  %v294_v26 = vld [vmem:[%s3214_s17 + $0x170] sm:$0xff]  ;;  %v3122_v43 = vld [vmem:[%s4036_s3 + $0x208] sm:$0xff]  }
  0x61   : > { %2895 = vmatpush3.bf16.msra.mxu1 %v3112_v63  ;;  %1994 = vmatprep.mubr.bf16.mxu0 %v1102_v48  ;;  %v612_v59 = vmul.f32 %v3278_v46, %v401_v21  ;;  %v391_v60 = vunpack.c.l.bf16 %v275_v18  ;;  %v400_v62 = vunpack.c.l.bf16 %v280_v25  ;;  %v408_v1 = vunpack.c.h.bf16 %v284_v51  ;;  %v3123_v18 = vld [vmem:[%s4036_s3 + $0x1c0] sm:$0xff]   ;;  %v290_v25 = vld [vmem:[%s3214_s17 + $0x154] sm:$0xff] }
  0x62   : > { %2896 = vmatprep.subr.bf16.mxu1 %v3114_v7  ;;  %1995 = vmatmul.mubr.bf16.gmra.mxu0 %v1101_v54  ;;  %v1109_v63 = vpack.c.bf16 %v983_v55, %v974_v49  ;;  %v973_v0 = vmax.f32 %v811_v56, 0.0  ;;  %v814_v30 = vadd.f32 %v3363_v31, %v603_v57  ;;  %v982_v2 = vmax.f32 %v820_v29, 0.0  ;;  %v3124_v48 = vld [vmem:[%s4036_s3 + $0x180] sm:$0xff]  }
  0x63   : > { %v823_v3 = vadd.f32 %v3363_v31, %v612_v59  ;;  %v602_v4 = vmul.f32 %v3274_v45, %v391_v60  ;;  %v611_v5 = vmul.f32 %v3274_v45, %v400_v62  ;;  %2984 = vmatpush3.bf16.msra.mxu0 %v3116_v53  ;;  %v417_v9 = vunpack.c.h.bf16 %v289_v52 }
  0x64   : > { %1890 = vmatmul.mubr.bf16.gmra.mxu1 %v1099_v19  ;;  %v976_v7 = vmax.f32 %v814_v30, 0.0  ;;  %v619_v10 = vmul.f32 %v3253_v33, %v408_v1  ;;  %v407_v11 = vunpack.c.l.bf16 %v284_v51  ;;  %v1108_v14 = vpack.c.bf16 %v982_v2, %v973_v0  ;;  %2985 = vmatprep.subr.bf16.mxu0 %v3136_v42  ;;  %v3125_v0 = vld [vmem:[%s4036_s3 + $0x200] sm:$0xff]  }
  0x65   : > { %2897 = vmatpush3.bf16.msra.mxu1 %v3115_v36  ;;  %1897 = vmatprep.mubr.bf16.mxu1 %v1109_v63  ;;  %v985_v15 = vmax.f32 %v823_v3, 0.0  ;;  %v813_v16 = vadd.f32 %v3500_v23, %v602_v4  ;;  %v822_v17 = vadd.f32 %v3500_v23, %v611_v5  ;;  %v628_v19 = vmul.f32 %v3253_v33, %v417_v9  ;;  %v295_v4 = vld [vmem:[%s3214_s17 + $0x178] sm:$0xff] }
  0x66   : > { %2898 = vmatprep.subr.bf16.mxu1 %v3117_v41  ;;  %v830_v22 = vadd.f32 %v3256_v34, %v619_v10  ;;  %v416_v27 = vunpack.c.l.bf16 %v289_v52  ;;  %v618_v24 = vmul.f32 %v3251_v32, %v407_v11  ;;  %v410_v39 = vunpack.c.h.bf16 %v285_v12  ;;  %v299_v52 = vld [vmem:[%s3214_s17 + $0x194] sm:$0xff]  ;;  %v300_v10 = vld [vmem:[%s3214_s17 + $0x19c] sm:$0xff] }
  0x67   : > { %v1111_v36 = vpack.c.bf16 %v985_v15, %v976_v7  ;;  %v975_v37 = vmax.f32 %v813_v16, 0.0  ;;  %v984_v38 = vmax.f32 %v822_v17, 0.0  ;;  %2986 = vmatpush3.bf16.msra.mxu0 %v3119_v6  ;;  %v839_v28 = vadd.f32 %v3256_v34, %v628_v19 }
  0x68   : > { %v992_v41 = vmax.f32 %v830_v22, 0.0  ;;  %v627_v47 = vmul.f32 %v3251_v32, %v416_v27  ;;  %v829_v20 = vadd.f32 %v3270_v44, %v618_v24  ;;  %2987 = vmatprep.subr.bf16.mxu0 %v3136_v42  ;;  %v419_v50 = vunpack.c.h.bf16 %v290_v25 }
  0x69   : > { %2899 = vmatpush3.bf16.msra.mxu1 %v3118_v58  ;;  %2002 = vmatprep.mubr.bf16.mxu0 %v1111_v36  ;;  %v1110_v49 = vpack.c.bf16 %v984_v38, %v975_v37  ;;  %v621_v21 = vmul.f32 %v3278_v46, %v410_v39  ;;  %v409_v51 = vunpack.c.l.bf16 %v285_v12  ;;  %v1001_v53 = vmax.f32 %v839_v28, 0.0 }
  0x6a   : > { %2900 = vmatprep.subr.bf16.mxu1 %v3120_v61  ;;  %v838_v54 = vadd.f32 %v3270_v44, %v627_v47  ;;  %v991_v55 = vmax.f32 %v829_v20, 0.0  ;;  %v418_v56 = vunpack.c.l.bf16 %v290_v25  ;;  %v630_v57 = vmul.f32 %v3278_v46, %v419_v50  ;;  %v304_v25 = vld [vmem:[%s3214_s17 + $0x1b8] sm:$0xff] }
  0x6b   : > { %2003 = vmatmul.mubr.bf16.gmra.mxu0 %v1110_v49  ;;  %v832_v58 = vadd.f32 %v3363_v31, %v621_v21  ;;  %v620_v29 = vmul.f32 %v3274_v45, %v409_v51  ;;  %v426_v59 = vunpack.c.h.bf16 %v294_v26  ;;  %v1118_v60 = vpack.c.bf16 %v1001_v53, %v992_v41 }
  0x6c   : > { %1898 = vmatmul.mubr.bf16.gmra.mxu1 %v1108_v14  ;;  %v1000_v62 = vmax.f32 %v838_v54, 0.0  ;;  %v629_v61 = vmul.f32 %v3274_v45, %v418_v56  ;;  %v435_v63 = vunpack.c.h.bf16 %v299_v52  ;;  %2988 = vmatpush3.bf16.msra.mxu0 %v3122_v43  ;;  %v841_v30 = vadd.f32 %v3363_v31, %v630_v57 }
  0x6d   : > { %2901 = vmatpush3.bf16.msra.mxu1 %v3121_v13  ;;  %v994_v1 = vmax.f32 %v832_v58, 0.0  ;;  %v831_v2 = vadd.f32 %v3500_v23, %v620_v29  ;;  %v637_v3 = vmul.f32 %v3253_v33, %v426_v59  ;;  %2989 = vmatprep.subr.bf16.mxu0 %v3136_v42  ;;  %v425_v9 = vunpack.c.l.bf16 %v294_v26  ;;  %v309_v26 = vld [vmem:[%s3214_s17 + $0x1dc] sm:$0xff] }
  0x6e   : > { %2902 = vmatprep.subr.bf16.mxu1 %v3123_v18  ;;  %1905 = vmatprep.mubr.bf16.mxu1 %v1118_v60  ;;  %v1117_v5 = vpack.c.bf16 %v1000_v62, %v991_v55  ;;  %v840_v6 = vadd.f32 %v3500_v23, %v629_v61  ;;  %v646_v7 = vmul.f32 %v3253_v33, %v435_v63  ;;  %v1003_v11 = vmax.f32 %v841_v30, 0.0  ;;  %v305_v58 = vld [vmem:[%s3214_s17 + $0x1c0] sm:$0xff] }
  0x6f   : > { %v993_v12 = vmax.f32 %v831_v2, 0.0  ;;  %v848_v13 = vadd.f32 %v3256_v34, %v637_v3  ;;  %v434_v14 = vunpack.c.l.bf16 %v299_v52  ;;  %v636_v17 = vmul.f32 %v3251_v32, %v425_v9 }
  0x70   : > { %v1002_v15 = vmax.f32 %v840_v6, 0.0  ;;  %v857_v16 = vadd.f32 %v3256_v34, %v646_v7  ;;  %v428_v18 = vunpack.c.h.bf16 %v295_v4  ;;  %2990 = vmatpush3.bf16.msra.mxu0 %v3125_v0  ;;  %v1120_v19 = vpack.c.bf16 %v1003_v11, %v994_v1  ;;  %v310_v1 = vld [vmem:[%s3214_s17 + $0x1e4] sm:$0xff] }
  0x71   : > { %2903 = vmatpush3.bf16.msra.mxu1 %v3124_v48  ;;  %v1010_v22 = vmax.f32 %v848_v13, 0.0  ;;  %v645_v27 = vmul.f32 %v3251_v32, %v434_v14  ;;  %v437_v24 = vunpack.c.h.bf16 %v300_v10  ;;  %v847_v38 = vadd.f32 %v3270_v44, %v636_v17  ;;  %v314_v11 = vld [vmem:[%s3214_s17 + $0x200] sm:$0xff] }
  0x72   : > { %v1119_v36 = vpack.c.bf16 %v1002_v15, %v993_v12  ;;  %v1019_v37 = vmax.f32 %v857_v16, 0.0  ;;  %v639_v39 = vmul.f32 %v3278_v46, %v428_v18  ;;  %2010 = vmatprep.mubr.bf16.mxu0 %v1120_v19  ;;  %v427_v47 = vunpack.c.l.bf16 %v295_v4  ;;  %v319_v16 = vld [vmem:[%s3214_s17 + $0x224] sm:$0xff] }
  0x73   : > { %v856_v28 = vadd.f32 %v3270_v44, %v645_v27  ;;  %v648_v41 = vmul.f32 %v3278_v46, %v437_v24  ;;  %v436_v20 = vunpack.c.l.bf16 %v300_v10  ;;  %v1009_v48 = vmax.f32 %v847_v38, 0.0 }
  0x74   : > { %1906 = vmatmul.mubr.bf16.gmra.mxu1 %v1117_v5  ;;  %2011 = vmatmul.mubr.bf16.gmra.mxu0 %v1119_v36  ;;  %v1127_v43 = vpack.c.bf16 %v1019_v37, %v1010_v22  ;;  %v850_v49 = vadd.f32 %v3363_v31, %v639_v39  ;;  %v444_v50 = vunpack.c.h.bf16 %v304_v25  ;;  %v638_v52 = vmul.f32 %v3274_v45, %v427_v47 }
  0x75   : > { %v1018_v21 = vmax.f32 %v856_v28, 0.0  ;;  %v859_v51 = vadd.f32 %v3363_v31, %v648_v41  ;;  %v647_v53 = vmul.f32 %v3274_v45, %v436_v20  ;;  %v453_v55 = vunpack.c.h.bf16 %v309_v26 }
  0x76   : > { %1913 = vmatprep.mubr.bf16.mxu1 %v1127_v43  ;;  %v1012_v54 = vmax.f32 %v850_v49, 0.0  ;;  %v655_v56 = vmul.f32 %v3253_v33, %v444_v50  ;;  %v443_v57 = vunpack.c.l.bf16 %v304_v25  ;;  %v849_v60 = vadd.f32 %v3500_v23, %v638_v52  ;;  %v315_v43 = vld [vmem:[%s3214_s17 + $0x208] sm:$0xff] }
  0x77   : > { %v1126_v29 = vpack.c.bf16 %v1018_v21, %v1009_v48  ;;  %v1021_v59 = vmax.f32 %v859_v51, 0.0  ;;  %v858_v62 = vadd.f32 %v3500_v23, %v647_v53  ;;  %v664_v61 = vmul.f32 %v3253_v33, %v453_v55  ;;  %v320_v51 = vld [vmem:[%s3214_s17 + $0x22c] sm:$0xff] }
  0x78   : > { %v866_v63 = vadd.f32 %v3256_v34, %v655_v56  ;;  %v452_v0 = vunpack.c.l.bf16 %v309_v26  ;;  %v654_v30 = vmul.f32 %v3251_v32, %v443_v57  ;;  %v1011_v3 = vmax.f32 %v849_v60, 0.0 }
  0x79   : > { %v1129_v2 = vpack.c.bf16 %v1021_v59, %v1012_v54  ;;  %v1020_v4 = vmax.f32 %v858_v62, 0.0  ;;  %v446_v5 = vunpack.c.h.bf16 %v305_v58  ;;  %v875_v6 = vadd.f32 %v3256_v34, %v664_v61 }
  0x7a   : > { %v1028_v7 = vmax.f32 %v866_v63, 0.0  ;;  %v663_v9 = vmul.f32 %v3251_v32, %v452_v0  ;;  %v865_v10 = vadd.f32 %v3270_v44, %v654_v30  ;;  %v455_v13 = vunpack.c.h.bf16 %v310_v1  ;;  %v324_v63 = vld [vmem:[%s3214_s17 + $0x248] sm:$0xff] }
  0x7b   : > { %2018 = vmatprep.mubr.bf16.mxu0 %v1129_v2  ;;  %v1128_v12 = vpack.c.bf16 %v1020_v4, %v1011_v3  ;;  %v657_v14 = vmul.f32 %v3278_v46, %v446_v5  ;;  %v445_v15 = vunpack.c.l.bf16 %v305_v58  ;;  %v1037_v17 = vmax.f32 %v875_v6, 0.0 }
  0x7c   : > { %1914 = vmatmul.mubr.bf16.gmra.mxu1 %v1126_v29  ;;  %v874_v18 = vadd.f32 %v3270_v44, %v663_v9  ;;  %v1027_v19 = vmax.f32 %v865_v10, 0.0  ;;  %v454_v22 = vunpack.c.l.bf16 %v310_v1  ;;  %v666_v27 = vmul.f32 %v3278_v46, %v455_v13 }
  0x7d   : > { %2019 = vmatmul.mubr.bf16.gmra.mxu0 %v1128_v12  ;;  %v868_v24 = vadd.f32 %v3363_v31, %v657_v14  ;;  %v656_v25 = vmul.f32 %v3274_v45, %v445_v15  ;;  %v462_v36 = vunpack.c.h.bf16 %v314_v11  ;;  %v1136_v37 = vpack.c.bf16 %v1037_v17, %v1028_v7  ;;  %v329_v7 = vld [vmem:[%s3214_s17 + $0x26c] sm:$0xff] }
  0x7e   : > { %v1036_v38 = vmax.f32 %v874_v18, 0.0  ;;  %v665_v39 = vmul.f32 %v3274_v45, %v454_v22  ;;  %v471_v28 = vunpack.c.h.bf16 %v319_v16  ;;  %v877_v41 = vadd.f32 %v3363_v31, %v666_v27  ;;  %v325_v27 = vld [vmem:[%s3214_s17 + $0x250] sm:$0xff] }
  0x7f   : > { %v1030_v47 = vmax.f32 %v868_v24, 0.0  ;;  %v867_v20 = vadd.f32 %v3500_v23, %v656_v25  ;;  %v673_v26 = vmul.f32 %v3253_v33, %v462_v36  ;;  %1921 = vmatprep.mubr.bf16.mxu1 %v1136_v37  ;;  %v461_v21 = vunpack.c.l.bf16 %v314_v11 }
  0x80   : > { %v1135_v48 = vpack.c.bf16 %v1036_v38, %v1027_v19  ;;  %v876_v49 = vadd.f32 %v3500_v23, %v665_v39  ;;  %v682_v50 = vmul.f32 %v3253_v33, %v471_v28  ;;  %v1039_v52 = vmax.f32 %v877_v41, 0.0 }
  0x81   : > { %v1029_v53 = vmax.f32 %v867_v20, 0.0  ;;  %v884_v54 = vadd.f32 %v3256_v34, %v673_v26  ;;  %v470_v55 = vunpack.c.l.bf16 %v319_v16  ;;  %v672_v58 = vmul.f32 %v3251_v32, %v461_v21 }
  0x82   : > { %v1038_v56 = vmax.f32 %v876_v49, 0.0  ;;  %v893_v57 = vadd.f32 %v3256_v34, %v682_v50  ;;  %v464_v29 = vunpack.c.h.bf16 %v315_v43  ;;  %v1138_v59 = vpack.c.bf16 %v1039_v52, %v1030_v47  ;;  %v330_v47 = vld [vmem:[%s3214_s17 + $0x274] sm:$0xff] }
  0x83   : > { %v1046_v60 = vmax.f32 %v884_v54, 0.0  ;;  %v681_v62 = vmul.f32 %v3251_v32, %v470_v55  ;;  %v473_v61 = vunpack.c.h.bf16 %v320_v51  ;;  %v883_v1 = vadd.f32 %v3270_v44, %v672_v58 }
  0x84   : > { %1922 = vmatmul.mubr.bf16.gmra.mxu1 %v1135_v48  ;;  %v1137_v0 = vpack.c.bf16 %v1038_v56, %v1029_v53  ;;  %v1055_v30 = vmax.f32 %v893_v57, 0.0  ;;  %v675_v2 = vmul.f32 %v3278_v46, %v464_v29  ;;  %2026 = vmatprep.mubr.bf16.mxu0 %v1138_v59  ;;  %v463_v5 = vunpack.c.l.bf16 %v315_v43  ;;  %v251_v59 = vld [vmem:[%s3214_s17 + $0x3c] sm:$0xff] }
  0x85   : > { %v892_v3 = vadd.f32 %v3270_v44, %v681_v62  ;;  %v684_v4 = vmul.f32 %v3278_v46, %v473_v61  ;;  %v472_v6 = vunpack.c.l.bf16 %v320_v51  ;;  %v1045_v10 = vmax.f32 %v883_v1, 0.0 }
  0x86   : > { %2027 = vmatmul.mubr.bf16.gmra.mxu0 %v1137_v0  ;;  %v1145_v9 = vpack.c.bf16 %v1055_v30, %v1046_v60  ;;  %v886_v11 = vadd.f32 %v3363_v31, %v675_v2  ;;  %v480_v12 = vunpack.c.h.bf16 %v324_v63  ;;  %v674_v15 = vmul.f32 %v3274_v45, %v463_v5 }
  0x87   : > { %v1054_v13 = vmax.f32 %v892_v3, 0.0  ;;  %v895_v14 = vadd.f32 %v3363_v31, %v684_v4  ;;  %v683_v16 = vmul.f32 %v3274_v45, %v472_v6  ;;  %v489_v18 = vunpack.c.h.bf16 %v329_v7  ;;  %v3126_v6 = vld [vmem:[%s4034_s1] sm:$0xff] }
  0x88   : > { %1929 = vmatprep.mubr.bf16.mxu1 %v1145_v9  ;;  %v1048_v17 = vmax.f32 %v886_v11, 0.0  ;;  %v691_v19 = vmul.f32 %v3253_v33, %v480_v12  ;;  %v479_v22 = vunpack.c.l.bf16 %v324_v63  ;;  %v885_v36 = vadd.f32 %v3500_v23, %v674_v15  ;;  %v247_v11 = vld [vmem:[%s3214_s17 + $0x20] ss:$36 sps:$4 sm:$0xff]  }
  0x89   : > { %v1144_v24 = vpack.c.bf16 %v1054_v13, %v1045_v10  ;;  %v1057_v25 = vmax.f32 %v895_v14, 0.0  ;;  %v894_v37 = vadd.f32 %v3500_v23, %v683_v16  ;;  %v700_v38 = vmul.f32 %v3253_v33, %v489_v18  ;;  %v246_v33 = vld [vmem:[%s3214_s17 + $0x18] sm:$0xff]  ;;  %v256_v16 = vld [vmem:[%s3214_s17 + $0x60] sm:$0xff] }
  0x8a   : > { %v902_v39 = vadd.f32 %v3256_v34, %v691_v19  ;;  %v488_v28 = vunpack.c.l.bf16 %v329_v7  ;;  %v690_v41 = vmul.f32 %v3251_v32, %v479_v22  ;;  %v1047_v26 = vmax.f32 %v885_v36, 0.0  ;;  %v261_v22 = vld [vmem:[%s3214_s17 + $0x84] sm:$0xff] }
  0x8b   : > { %v1147_v20 = vpack.c.bf16 %v1057_v25, %v1048_v17  ;;  %v1056_v43 = vmax.f32 %v894_v37, 0.0  ;;  %v482_v48 = vunpack.c.h.bf16 %v325_v27  ;;  %v911_v49 = vadd.f32 %v3256_v34, %v700_v38  ;;  %v3784_v38 = vld [vmem:[%s4035_s2 + $0x8] ss:$0 sm:$0xff] }
  0x8c   : > { %1930 = vmatmul.mubr.bf16.gmra.mxu1 %v1144_v24  ;;  %v1064_v50 = vmax.f32 %v902_v39, 0.0  ;;  %v699_v21 = vmul.f32 %v3251_v32, %v488_v28  ;;  %v901_v51 = vadd.f32 %v3270_v44, %v690_v41  ;;  %v491_v53 = vunpack.c.h.bf16 %v330_v47 }
  0x8d   : > { %2034 = vmatprep.mubr.bf16.mxu0 %v1147_v20  ;;  %v1146_v52 = vpack.c.bf16 %v1056_v43, %v1047_v26  ;;  %v693_v54 = vmul.f32 %v3278_v46, %v482_v48  ;;  %v481_v55 = vunpack.c.l.bf16 %v325_v27  ;;  %v1073_v56 = vmax.f32 %v911_v49, 0.0 }
  0x8e   : > { %v910_v57 = vadd.f32 %v3270_v44, %v699_v21  ;;  %v1063_v58 = vmax.f32 %v901_v51, 0.0  ;;  %v490_v29 = vunpack.c.l.bf16 %v330_v47  ;;  %v702_v34 = vmul.f32 %v3278_v46, %v491_v53 }
  0x8f   : > { %2035 = vmatmul.mubr.bf16.gmra.mxu0 %v1146_v52  ;;  %v904_v32 = vadd.f32 %v3363_v31, %v693_v54  ;;  %v692_v60 = vmul.f32 %v3274_v45, %v481_v55  ;;  %v339_v62 = vunpack.c.l.bf16 %v246_v33  ;;  %v1154_v61 = vpack.c.bf16 %v1073_v56, %v1064_v50  ;;  %v257_v50 = vld [vmem:[%s3214_s17 + $0x68] ss:$36 sps:$4 sm:$0xff]  }
  0x90   : > { %v1072_v63 = vmax.f32 %v910_v57, 0.0  ;;  %v701_v0 = vmul.f32 %v3274_v45, %v490_v29  ;;  %v340_v30 = vunpack.c.h.bf16 %v246_v33  ;;  %v913_v1 = vadd.f32 %v3363_v31, %v702_v34  ;;  %v266_v57 = vld [vmem:[%s3214_s17 + $0xa8] sm:$0xff] }
  0x91   : > { %v1066_v44 = vmax.f32 %v904_v32, 0.0  ;;  %v903_v2 = vadd.f32 %v3500_v23, %v692_v60  ;;  %v348_v3 = vunpack.c.l.bf16 %v251_v59  ;;  %1937 = vmatprep.mubr.bf16.mxu1 %v1154_v61  ;;  %v349_v5 = vunpack.c.h.bf16 %v251_v59  ;;  %v271_v32 = vld [vmem:[%s3214_s17 + $0xcc] sm:$0xff] }
  0x92   : > { %v1153_v4 = vpack.c.bf16 %v1072_v63, %v1063_v58  ;;  %v912_v46 = vadd.f32 %v3500_v23, %v701_v0  ;;  %v3748_v45 = vrot.slane %v3126_v6, %v525_v40  ;;  %v1075_v7 = vmax.f32 %v913_v1, 0.0  ;;  %v3127_v23 = vld [vmem:[%s4035_s2] sm:$0xff] }
  0x93   : > { %v1065_v31 = vmax.f32 %v903_v2, 0.0  ;;  %v3752_v9 = vrot.slane %v3126_v6, %v529_v35  ;;  %v3759_v10 = vrot.slane %v3127_v23, %v529_v35  ;;  %v3766_v15 = vrot.slane %v3127_v23, %v525_v40  ;;  %v3774_v35 = vld [vmem:[%s4034_s1 + $0x8] ss:$0 sm:$0xff] }
  0x94   : > { %1938 = vmatmul.mubr.bf16.gmra.mxu1 %v1153_v4  ;;  %v1074_v12 = vmax.f32 %v912_v46, 0.0  ;;  %v550_v13 = vmul.f32 %v3748_v45, %v339_v62  ;;  %v559_v14 = vmul.f32 %v3748_v45, %v348_v3  ;;  %v1156_v17 = vpack.c.bf16 %v1075_v7, %v1066_v44 }
  0x95   : > { %v551_v18 = vmul.f32 %v3752_v9, %v340_v30  ;;  %v560_v19 = vmul.f32 %v3752_v9, %v349_v5  ;;  %v341_v8 = vunpack.c.l.bf16 %v247_v11  ;;  %v350_v37 = vunpack.c.h.bf16 %v247_v11  ;;  %v267_v5 = vld [vmem:[%s3214_s17 + $0xb0] ss:$36 sps:$4 sm:$0xff]  }
  0x96   : > { %v1155_v27 = vpack.c.bf16 %v1074_v12, %v1065_v31  ;;  %v761_v24 = vadd.f32 %v3766_v15, %v550_v13  ;;  %v770_v25 = vadd.f32 %v3766_v15, %v559_v14  ;;  %2042 = vmatprep.mubr.bf16.mxu0 %v1156_v17  ;;  %v358_v39 = vunpack.c.h.bf16 %v256_v16 }
  0x97   : > { %v762_v40 = vadd.f32 %v3759_v10, %v551_v18  ;;  %v771_v36 = vadd.f32 %v3759_v10, %v560_v19  ;;  %v552_v47 = vmul.f32 %v3774_v35, %v341_v8  ;;  %v367_v20 = vunpack.c.h.bf16 %v261_v22 }
  0x98   : > { %2043 = vmatmul.mubr.bf16.gmra.mxu0 %v1155_v27  ;;  %v923_v28 = vmax.f32 %v761_v24, 0.0  ;;  %v932_v41 = vmax.f32 %v770_v25, 0.0  ;;  %v561_v48 = vmul.f32 %v3774_v35, %v350_v37  ;;  %v569_v49 = vmul.f32 %v3752_v9, %v358_v39 }
  0x99   : > { %v924_v26 = vmax.f32 %v762_v40, 0.0  ;;  %v933_v43 = vmax.f32 %v771_v36, 0.0  ;;  %2991 = vmatprep.mubr.msk.bf16.mxu0 %vm3137_vm0, %v3136_v42  ;;  %v763_v51 = vadd.f32 %v3784_v38, %v552_v47  ;;  %v578_v33 = vmul.f32 %v3752_v9, %v367_v20  ;;  %v281_v40 = vld [vmem:[%s3214_s17 + $0x114] sm:$0xff] }
  0x9a   : > { %v1085_v21 = vpack.c.bf16 %v932_v41, %v923_v28  ;;  %v357_v52 = vunpack.c.l.bf16 %v256_v16  ;;  %v772_v54 = vadd.f32 %v3784_v38, %v561_v48  ;;  %v780_v55 = vadd.f32 %v3759_v10, %v569_v49 }
  0x9b   : > { %v1086_v53 = vpack.c.bf16 %v933_v43, %v924_v26  ;;  %v366_v56 = vunpack.c.l.bf16 %v261_v22  ;;  %v925_v58 = vmax.f32 %v763_v51, 0.0  ;;  %v789_v29 = vadd.f32 %v3759_v10, %v578_v33  ;;  %v276_v22 = vld [vmem:[%s3214_s17 + $0xf0] sm:$0xff] }
  0x9c   : > { %v568_v59 = vmul.f32 %v3748_v45, %v357_v52  ;;  %v359_v34 = vunpack.c.l.bf16 %v257_v50  ;;  %v934_v60 = vmax.f32 %v772_v54, 0.0  ;;  %v942_v62 = vmax.f32 %v780_v55, 0.0 }
  0x9d   : > { %2083 = vmatprep.mubr.bf16.mxu1 %v1086_v53  ;;  %v577_v61 = vmul.f32 %v3748_v45, %v366_v56  ;;  %v368_v63 = vunpack.c.h.bf16 %v257_v50  ;;  %v951_v0 = vmax.f32 %v789_v29, 0.0  ;;  %v376_v44 = vunpack.c.h.bf16 %v266_v57 }
  0x9e   : > { %2084 = vmatmul.mubr.bf16.vlgmr.msra.gmra.mxu1 %v1085_v21  ;;  %v779_v30 = vadd.f32 %v3766_v15, %v568_v59  ;;  %v570_v1 = vmul.f32 %v3774_v35, %v359_v34  ;;  %v1087_v2 = vpack.c.bf16 %v934_v60, %v925_v58  ;;  %v385_v46 = vunpack.c.h.bf16 %v271_v32  ;;  %v277_v21 = vld [vmem:[%s3214_s17 + $0xf8] ss:$36 sps:$4 sm:$0xff]  }
  0x9f   : > { %v788_v3 = vadd.f32 %v3766_v15, %v577_v61  ;;  %v579_v4 = vmul.f32 %v3774_v35, %v368_v63  ;;  %v1095_v6 = vpack.c.bf16 %v951_v0, %v942_v62  ;;  %v587_v23 = vmul.f32 %v3752_v9, %v376_v44  ;;  %v291_v0 = vld [vmem:[%s3214_s17 + $0x15c] sm:$0xff] }
  0xa0   : > { %v941_v7 = vmax.f32 %v779_v30, 0.0  ;;  %v781_v31 = vadd.f32 %v3784_v38, %v570_v1  ;;  %2992 = vmatmul.mubr.bf16.vlgmr.msra.gmra.mxu0 %v1087_v2  ;;  %v596_v13 = vmul.f32 %v3752_v9, %v385_v46  ;;  %v375_v14 = vunpack.c.l.bf16 %v266_v57 }
  0xa1   : > { %v950_v11 = vmax.f32 %v788_v3, 0.0  ;;  %v790_v12 = vadd.f32 %v3784_v38, %v579_v4  ;;  %2091 = vmatprep.mubr.bf16.mxu1 %v1095_v6  ;;  %2995 = vmatprep.mubr.msk.bf16.mxu0 %vm3137_vm0, %v3136_v42  ;;  %v798_v17 = vadd.f32 %v3759_v10, %v587_v23  ;;  %v384_v18 = vunpack.c.l.bf16 %v271_v32  ;;  %v286_v32 = vld [vmem:[%s3214_s17 + $0x138] sm:$0xff] }
  0xa2   : > { %v943_v16 = vmax.f32 %v781_v31, 0.0  ;;  %v377_v19 = vunpack.c.l.bf16 %v267_v5  ;;  %v807_v25 = vadd.f32 %v3759_v10, %v596_v13  ;;  %v586_v8 = vmul.f32 %v3748_v45, %v375_v14 }
  0xa3   : > { %v1094_v27 = vpack.c.bf16 %v950_v11, %v941_v7  ;;  %v952_v24 = vmax.f32 %v790_v12, 0.0  ;;  %v960_v36 = vmax.f32 %v798_v17, 0.0  ;;  %v595_v37 = vmul.f32 %v3748_v45, %v384_v18  ;;  %v287_v11 = vld [vmem:[%s3214_s17 + $0x140] ss:$36 sps:$4 sm:$0xff]  }
  0xa4   : > { %v386_v39 = vunpack.c.h.bf16 %v267_v5  ;;  %v588_v28 = vmul.f32 %v3774_v35, %v377_v19  ;;  %v969_v47 = vmax.f32 %v807_v25, 0.0  ;;  %v797_v20 = vadd.f32 %v3766_v15, %v586_v8 }
  0xa5   : > { %v1096_v41 = vpack.c.bf16 %v952_v24, %v943_v16  ;;  %v394_v26 = vunpack.c.h.bf16 %v276_v22  ;;  %v806_v43 = vadd.f32 %v3766_v15, %v595_v37  ;;  %v403_v50 = vunpack.c.h.bf16 %v281_v40 }
  0xa6   : > { %2092 = vmatmul.mubr.bf16.gmra.mxu1 %v1094_v27  ;;  %v597_v48 = vmul.f32 %v3774_v35, %v386_v39  ;;  %v799_v49 = vadd.f32 %v3784_v38, %v588_v28  ;;  %v1104_v51 = vpack.c.bf16 %v969_v47, %v960_v36  ;;  %v959_v33 = vmax.f32 %v797_v20, 0.0 }
  0xa7   : > { %v605_v52 = vmul.f32 %v3752_v9, %v394_v26  ;;  %v393_v53 = vunpack.c.l.bf16 %v276_v22  ;;  %v968_v54 = vmax.f32 %v806_v43, 0.0  ;;  %v614_v57 = vmul.f32 %v3752_v9, %v403_v50 }
  0xa8   : > { %v808_v55 = vadd.f32 %v3784_v38, %v597_v48  ;;  %v961_v56 = vmax.f32 %v799_v49, 0.0  ;;  %2996 = vmatmul.mubr.bf16.gmra.mxu0 %v1096_v41  ;;  %2099 = vmatprep.mubr.bf16.mxu1 %v1104_v51  ;;  %v402_v29 = vunpack.c.l.bf16 %v281_v40  ;;  %v395_v34 = vunpack.c.l.bf16 %v277_v21  ;;  %v296_v40 = vld [vmem:[%s3214_s17 + $0x180] sm:$0xff] }
  0xa9   : > { %v816_v58 = vadd.f32 %v3759_v10, %v605_v52  ;;  %v604_v59 = vmul.f32 %v3748_v45, %v393_v53  ;;  %v1103_v60 = vpack.c.bf16 %v968_v54, %v959_v33  ;;  %2999 = vmatprep.mubr.msk.bf16.mxu0 %vm3137_vm0, %v3136_v42  ;;  %v825_v61 = vadd.f32 %v3759_v10, %v614_v57  ;;  %v301_v41 = vld [vmem:[%s3214_s17 + $0x1a4] sm:$0xff] }
  0xaa   : > { %v970_v62 = vmax.f32 %v808_v55, 0.0  ;;  %v404_v63 = vunpack.c.h.bf16 %v277_v21  ;;  %v613_v1 = vmul.f32 %v3748_v45, %v402_v29  ;;  %v606_v2 = vmul.f32 %v3774_v35, %v395_v34  ;;  %v297_v54 = vld [vmem:[%s3214_s17 + $0x188] ss:$36 sps:$4 sm:$0xff]  }
  0xab   : > { %v978_v30 = vmax.f32 %v816_v58, 0.0  ;;  %v815_v44 = vadd.f32 %v3766_v15, %v604_v59  ;;  %v987_v4 = vmax.f32 %v825_v61, 0.0  ;;  %v412_v5 = vunpack.c.h.bf16 %v286_v32 }
  0xac   : > { %v1105_v3 = vpack.c.bf16 %v970_v62, %v961_v56  ;;  %v615_v46 = vmul.f32 %v3774_v35, %v404_v63  ;;  %v824_v6 = vadd.f32 %v3766_v15, %v613_v1  ;;  %v817_v31 = vadd.f32 %v3784_v38, %v606_v2 }
  0xad   : > { %v977_v7 = vmax.f32 %v815_v44, 0.0  ;;  %v421_v23 = vunpack.c.h.bf16 %v291_v0  ;;  %v1113_v12 = vpack.c.bf16 %v987_v4, %v978_v30  ;;  %v623_v14 = vmul.f32 %v3752_v9, %v412_v5  ;;  %v311_v44 = vld [vmem:[%s3214_s17 + $0x1ec] sm:$0xff] }
  0xae   : > { %2100 = vmatmul.mubr.bf16.gmra.mxu1 %v1103_v60  ;;  %v826_v13 = vadd.f32 %v3784_v38, %v615_v46  ;;  %v411_v16 = vunpack.c.l.bf16 %v286_v32  ;;  %v986_v17 = vmax.f32 %v824_v6, 0.0  ;;  %v979_v18 = vmax.f32 %v817_v31, 0.0  ;;  %v306_v32 = vld [vmem:[%s3214_s17 + $0x1c8] sm:$0xff] }
  0xaf   : > { %v632_v19 = vmul.f32 %v3752_v9, %v421_v23  ;;  %v420_v22 = vunpack.c.l.bf16 %v291_v0  ;;  %2107 = vmatprep.mubr.bf16.mxu1 %v1113_v12  ;;  %v834_v24 = vadd.f32 %v3759_v10, %v623_v14  ;;  %v413_v8 = vunpack.c.l.bf16 %v287_v11  ;;  %v307_v14 = vld [vmem:[%s3214_s17 + $0x1d0] ss:$36 sps:$4 sm:$0xff]  }
  0xb0   : > { %v988_v27 = vmax.f32 %v826_v13, 0.0  ;;  %v622_v25 = vmul.f32 %v3748_v45, %v411_v16  ;;  %3000 = vmatmul.mubr.bf16.gmra.mxu0 %v1105_v3  ;;  %v1112_v36 = vpack.c.bf16 %v986_v17, %v977_v7  ;;  %v422_v28 = vunpack.c.h.bf16 %v287_v11 }
  0xb1   : > { %v843_v37 = vadd.f32 %v3759_v10, %v632_v19  ;;  %v631_v39 = vmul.f32 %v3748_v45, %v420_v22  ;;  %3003 = vmatprep.mubr.msk.bf16.mxu0 %vm3137_vm0, %v3136_v42  ;;  %v996_v20 = vmax.f32 %v834_v24, 0.0  ;;  %v624_v43 = vmul.f32 %v3774_v35, %v413_v8 }
  0xb2   : > { %v1114_v47 = vpack.c.bf16 %v988_v27, %v979_v18  ;;  %v833_v26 = vadd.f32 %v3766_v15, %v622_v25  ;;  %v633_v50 = vmul.f32 %v3774_v35, %v422_v28  ;;  %v430_v21 = vunpack.c.h.bf16 %v296_v40  ;;  %v316_v25 = vld [vmem:[%s3214_s17 + $0x210] sm:$0xff] }
  0xb3   : > { %v1005_v48 = vmax.f32 %v843_v37, 0.0  ;;  %v842_v49 = vadd.f32 %v3766_v15, %v631_v39  ;;  %v835_v33 = vadd.f32 %v3784_v38, %v624_v43  ;;  %v439_v52 = vunpack.c.h.bf16 %v301_v41  ;;  %v321_v39 = vld [vmem:[%s3214_s17 + $0x234] sm:$0xff] }
  0xb4   : > { %v995_v51 = vmax.f32 %v833_v26, 0.0  ;;  %v429_v53 = vunpack.c.l.bf16 %v296_v40  ;;  %v844_v57 = vadd.f32 %v3784_v38, %v633_v50  ;;  %v641_v58 = vmul.f32 %v3752_v9, %v430_v21 }
  0xb5   : > { %v1122_v55 = vpack.c.bf16 %v1005_v48, %v996_v20  ;;  %v1004_v56 = vmax.f32 %v842_v49, 0.0  ;;  %v650_v29 = vmul.f32 %v3752_v9, %v439_v52  ;;  %v438_v59 = vunpack.c.l.bf16 %v301_v41 }
  0xb6   : > { %2108 = vmatmul.mubr.bf16.gmra.mxu1 %v1112_v36  ;;  %v640_v34 = vmul.f32 %v3748_v45, %v429_v53  ;;  %v997_v60 = vmax.f32 %v835_v33, 0.0  ;;  %v852_v62 = vadd.f32 %v3759_v10, %v641_v58  ;;  %v431_v61 = vunpack.c.l.bf16 %v297_v54 }
  0xb7   : > { %2115 = vmatprep.mubr.bf16.mxu1 %v1122_v55  ;;  %v1121_v63 = vpack.c.bf16 %v1004_v56, %v995_v51  ;;  %v861_v0 = vadd.f32 %v3759_v10, %v650_v29  ;;  %v649_v30 = vmul.f32 %v3748_v45, %v438_v59  ;;  %v440_v1 = vunpack.c.h.bf16 %v297_v54  ;;  %v317_v55 = vld [vmem:[%s3214_s17 + $0x218] ss:$36 sps:$4 sm:$0xff]  }
  0xb8   : > { %3004 = vmatmul.mubr.bf16.gmra.mxu0 %v1114_v47  ;;  %v1006_v2 = vmax.f32 %v844_v57, 0.0  ;;  %v1014_v3 = vmax.f32 %v852_v62, 0.0  ;;  %v642_v4 = vmul.f32 %v3774_v35, %v431_v61  ;;  %v448_v46 = vunpack.c.h.bf16 %v306_v32  ;;  %v326_v59 = vld [vmem:[%s3214_s17 + $0x258] sm:$0xff] }
  0xb9   : > { %3007 = vmatprep.mubr.msk.bf16.mxu0 %vm3137_vm0, %v3136_v42  ;;  %v1023_v5 = vmax.f32 %v861_v0, 0.0  ;;  %v851_v6 = vadd.f32 %v3766_v15, %v640_v34  ;;  %v860_v7 = vadd.f32 %v3766_v15, %v649_v30  ;;  %v651_v31 = vmul.f32 %v3774_v35, %v440_v1  ;;  %v331_v1 = vld [vmem:[%s3214_s17 + $0x27c] sm:$0xff] }
  0xba   : > { %v853_v23 = vadd.f32 %v3784_v38, %v642_v4  ;;  %v457_v11 = vunpack.c.h.bf16 %v311_v44  ;;  %v659_v12 = vmul.f32 %v3752_v9, %v448_v46  ;;  %v447_v13 = vunpack.c.l.bf16 %v306_v32 }
  0xbb   : > { %v1131_v16 = vpack.c.bf16 %v1023_v5, %v1014_v3  ;;  %v862_v17 = vadd.f32 %v3784_v38, %v651_v31  ;;  %v456_v18 = vunpack.c.l.bf16 %v311_v44  ;;  %v1123_v19 = vpack.c.bf16 %v1006_v2, %v997_v60 }
  0xbc   : > { %v668_v22 = vmul.f32 %v3752_v9, %v457_v11  ;;  %v870_v27 = vadd.f32 %v3759_v10, %v659_v12  ;;  %v658_v24 = vmul.f32 %v3748_v45, %v447_v13  ;;  %v1013_v8 = vmax.f32 %v851_v6, 0.0  ;;  %v327_v11 = vld [vmem:[%s3214_s17 + $0x260] ss:$36 sps:$4 sm:$0xff]   ;;  %s2511_s17 = sshll.u32 %s4040_s22, 2  ;;  %s2512_s22 = sshll.u32 %s4042_s19, 1 }
  0xbd   : > { %v1022_v40 = vmax.f32 %v860_v7, 0.0  ;;  %v667_v36 = vmul.f32 %v3748_v45, %v456_v18  ;;  %v449_v37 = vunpack.c.l.bf16 %v307_v14  ;;  %v1015_v28 = vmax.f32 %v853_v23, 0.0  ;;  %s3998_s10 = scalar_lea.vmem %s4037_s4, %s2511_s17  ;;  %s241_s13 = scalar_lea.vmem %s4038_s5, %s2512_s22 }
  0xbe   : > { %2116 = vmatmul.mubr.bf16.gmra.mxu1 %v1121_v63  ;;  %v879_v41 = vadd.f32 %v3759_v10, %v668_v22  ;;  %v1032_v47 = vmax.f32 %v870_v27, 0.0  ;;  %v458_v20 = vunpack.c.h.bf16 %v307_v14  ;;  %v1024_v26 = vmax.f32 %v862_v17, 0.0 }
  0xbf   : > { %2123 = vmatprep.mubr.bf16.mxu1 %v1131_v16  ;;  %v869_v43 = vadd.f32 %v3766_v15, %v658_v24  ;;  %v660_v48 = vmul.f32 %v3774_v35, %v449_v37  ;;  %v466_v49 = vunpack.c.h.bf16 %v316_v25  ;;  %v878_v21 = vadd.f32 %v3766_v15, %v667_v36 }
  0xc0   : > { %3008 = vmatmul.mubr.bf16.gmra.mxu0 %v1123_v19  ;;  %v1041_v50 = vmax.f32 %v879_v41, 0.0  ;;  %v669_v51 = vmul.f32 %v3774_v35, %v458_v20  ;;  %v475_v33 = vunpack.c.h.bf16 %v321_v39  ;;  %v1130_v52 = vpack.c.bf16 %v1022_v40, %v1013_v8 }
  0xc1   : > { %3011 = vmatprep.mubr.msk.bf16.mxu0 %vm3137_vm0, %v3136_v42  ;;  %v677_v53 = vmul.f32 %v3752_v9, %v466_v49  ;;  %v465_v54 = vunpack.c.l.bf16 %v316_v25  ;;  %v871_v57 = vadd.f32 %v3784_v38, %v660_v48  ;;  %v474_v29 = vunpack.c.l.bf16 %v321_v39 }
  0xc2   : > { %v1140_v56 = vpack.c.bf16 %v1041_v50, %v1032_v47  ;;  %v686_v58 = vmul.f32 %v3752_v9, %v475_v33  ;;  %v1132_v34 = vpack.c.bf16 %v1024_v26, %v1015_v28  ;;  %v1031_v32 = vmax.f32 %v869_v43, 0.0 }
  0xc3   : > { %v880_v60 = vadd.f32 %v3784_v38, %v669_v51  ;;  %v888_v62 = vadd.f32 %v3759_v10, %v677_v53  ;;  %v1040_v61 = vmax.f32 %v878_v21, 0.0  ;;  %v676_v0 = vmul.f32 %v3748_v45, %v465_v54 }
  0xc4   : > { %v897_v63 = vadd.f32 %v3759_v10, %v686_v58  ;;  %v467_v30 = vunpack.c.l.bf16 %v317_v55  ;;  %v685_v44 = vmul.f32 %v3748_v45, %v474_v29  ;;  %v476_v2 = vunpack.c.h.bf16 %v317_v55 }
  0xc5   : > { %v484_v3 = vunpack.c.h.bf16 %v326_v59  ;;  %v1033_v4 = vmax.f32 %v871_v57, 0.0  ;;  %v1050_v46 = vmax.f32 %v888_v62, 0.0  ;;  %v1042_v6 = vmax.f32 %v880_v60, 0.0 }
  0xc6   : > { %2124 = vmatmul.mubr.bf16.gmra.mxu1 %v1130_v52  ;;  %v1059_v5 = vmax.f32 %v897_v63, 0.0  ;;  %v678_v7 = vmul.f32 %v3774_v35, %v467_v30  ;;  %v493_v31 = vunpack.c.h.bf16 %v331_v1  ;;  %v1139_v12 = vpack.c.bf16 %v1040_v61, %v1031_v32 }
  0xc7   : > { %2131 = vmatprep.mubr.bf16.mxu1 %v1140_v56  ;;  %v695_v23 = vmul.f32 %v3752_v9, %v484_v3  ;;  %v887_v13 = vadd.f32 %v3766_v15, %v676_v0  ;;  %v687_v14 = vmul.f32 %v3774_v35, %v476_v2  ;;  %v483_v16 = vunpack.c.l.bf16 %v326_v59 }
  0xc8   : > { %3012 = vmatmul.mubr.bf16.gmra.mxu0 %v1132_v34  ;;  %v896_v17 = vadd.f32 %v3766_v15, %v685_v44  ;;  %v704_v18 = vmul.f32 %v3752_v9, %v493_v31  ;;  %v492_v22 = vunpack.c.l.bf16 %v331_v1  ;;  %v1149_v27 = vpack.c.bf16 %v1059_v5, %v1050_v46 }
  0xc9   : > { %3015 = vmatprep.mubr.msk.bf16.mxu0 %vm3137_vm0, %v3136_v42  ;;  %v906_v19 = vadd.f32 %v3759_v10, %v695_v23  ;;  %v694_v24 = vmul.f32 %v3748_v45, %v483_v16  ;;  %v485_v25 = vunpack.c.l.bf16 %v327_v11  ;;  %v1141_v8 = vpack.c.bf16 %v1042_v6, %v1033_v4 }
  0xca   : > { %v889_v40 = vadd.f32 %v3784_v38, %v678_v7  ;;  %v915_v36 = vadd.f32 %v3759_v10, %v704_v18  ;;  %v703_v37 = vmul.f32 %v3748_v45, %v492_v22  ;;  %v898_v39 = vadd.f32 %v3784_v38, %v687_v14 }
  0xcb   : > { %v905_v28 = vadd.f32 %v3766_v15, %v694_v24  ;;  %v494_v41 = vunpack.c.h.bf16 %v327_v11  ;;  %v696_v9 = vmul.f32 %v3774_v35, %v485_v25  ;;  %v1049_v47 = vmax.f32 %v887_v13, 0.0 }
  0xcc   : > { %v1058_v20 = vmax.f32 %v896_v17, 0.0  ;;  %v1068_v26 = vmax.f32 %v906_v19, 0.0  ;;  %v914_v43 = vadd.f32 %v3766_v15, %v703_v37  ;;  %v1077_v48 = vmax.f32 %v915_v36, 0.0 }
  0xcd   : > { %v1067_v49 = vmax.f32 %v905_v28, 0.0  ;;  %v705_v10 = vmul.f32 %v3774_v35, %v494_v41  ;;  %v907_v45 = vadd.f32 %v3784_v38, %v696_v9  ;;  %v1051_v21 = vmax.f32 %v889_v40, 0.0 }
  0xce   : > { %2132 = vmatmul.mubr.bf16.gmra.mxu1 %v1139_v12  ;;  %v1076_v50 = vmax.f32 %v914_v43, 0.0  ;;  %v1060_v51 = vmax.f32 %v898_v39, 0.0  ;;  %v1148_v53 = vpack.c.bf16 %v1058_v20, %v1049_v47  ;;  %v1158_v15 = vpack.c.bf16 %v1077_v48, %v1068_v26 }
  0xcf   : > { %2139 = vmatprep.mubr.bf16.mxu1 %v1149_v27  ;;  %v916_v33 = vadd.f32 %v3784_v38, %v705_v10  ;;  %v1069_v52 = vmax.f32 %v907_v45, 0.0 }
  0xd0   : > { %3016 = vmatmul.mubr.bf16.gmra.mxu0 %v1141_v8  ;;  %v1157_v54 = vpack.c.bf16 %v1076_v50, %v1067_v49  ;;  %v1150_v56 = vpack.c.bf16 %v1060_v51, %v1051_v21 }
  0xd1   : > { %3019 = vmatprep.mubr.msk.bf16.mxu0 %vm3137_vm0, %v3136_v42  ;;  %v1078_v55 = vmax.f32 %v916_v33, 0.0 }
  0xd3   : > { %v1159_v57 = vpack.c.bf16 %v1078_v55, %v1069_v52 }
  0xd6   : > { %2140 = vmatmul.mubr.bf16.gmra.mxu1 %v1148_v53 }
  0xd7   : > { %2147 = vmatprep.mubr.bf16.mxu1 %v1158_v15 }
  0xd8   : > { %3020 = vmatmul.mubr.bf16.gmra.mxu0 %v1150_v56 }
  0xd9   : > { %3023 = vmatprep.mubr.msk.bf16.mxu0 %vm3137_vm0, %v3136_v42 }
  0xde   : > { %2148 = vmatmul.mubr.bf16.gmra.mxu1 %v1157_v54 }
  0xe0   : > { %3024 = vmatmul.mubr.bf16.gmra.mxu0 %v1159_v57 }
  0xec   : > { %v2718_v35 = vpop.f32.mrf.mxu1  ;;  %v2694_v29 = vpop.f32.mrf.mxu0 }
  0xee   : > { %v2719_v38 = vpop.f32.mrf.mxu1  ;;  %v2695_v34 = vpop.f32.mrf.mxu0 }
  0xef   : > { %v3926_v58 = vadd.f32 %v2719_v38, %v2718_v35  ;;  %v2696_v60 = vadd.f32 %v2695_v34, %v2694_v29 }
  0xf0   : > { %v2721_v59 = vpop.f32.mrf.mxu1  ;;  %v2697_v61 = vpop.f32.mrf.mxu0 }
  0xf2   : > { %v2722_v32 = vpop.f32.mrf.mxu1  ;;  %v2698_v0 = vpop.f32.mrf.mxu0 }
  0xf3   : > { %v3928_v62 = vadd.f32 %v2722_v32, %v2721_v59  ;;  %v2699_v1 = vadd.f32 %v2698_v0, %v2697_v61 }
  0xf4   : > { %v2724_v63 = vpop.f32.mrf.mxu1  ;;  %v2700_v2 = vpop.f32.mrf.mxu0 }
  0xf6   : > { %v2725_v30 = vpop.f32.mrf.mxu1  ;;  %v2701_v46 = vpop.f32.mrf.mxu0 }
  0xf7   : > { %v3930_v44 = vadd.f32 %v2725_v30, %v2724_v63  ;;  %v2702_v6 = vadd.f32 %v2701_v46, %v2700_v2 }
  0xf8   : > { %v2727_v42 = vpop.f32.mrf.mxu1  ;;  %v2703_v7 = vpop.f32.mrf.mxu0 }
  0xfa   : > { %v2728_v3 = vpop.f32.mrf.mxu1  ;;  %v2704_v11 = vpop.f32.mrf.mxu0 }
  0xfb   : > { %v3932_v4 = vadd.f32 %v2728_v3, %v2727_v42  ;;  %v2705_v13 = vadd.f32 %v2704_v11, %v2703_v7 }
  0xfc   : > { %v2730_v5 = vpop.f32.mrf.mxu1 }
  0xfe   : > { %v2731_v31 = vpop.f32.mrf.mxu1 }
  0xff   : > { %v3934_v23 = vadd.f32 %v2731_v31, %v2730_v5  ;;  %v2706_v17 = vpop.f32.mrf.mxu0 }
 0x100   : > { %v2733_v12 = vpop.f32.mrf.mxu1 }
 0x101   : > { %v2707_v19 = vpop.f32.mrf.mxu0 }
 0x102   : > { %v2734_v14 = vpop.f32.mrf.mxu1  ;;  %v2708_v27 = vadd.f32 %v2707_v19, %v2706_v17 }
 0x103   : > { %v3936_v16 = vadd.f32 %v2734_v14, %v2733_v12  ;;  %v2709_v25 = vpop.f32.mrf.mxu0 }
 0x104   : > { %v2736_v18 = vpop.f32.mrf.mxu1 }
 0x105   : > { %v2710_v40 = vpop.f32.mrf.mxu0 }
 0x106   : > { %v2737_v22 = vpop.f32.mrf.mxu1  ;;  %v2711_v37 = vadd.f32 %v2710_v40, %v2709_v25 }
 0x107   : > { %v3938_v24 = vadd.f32 %v2737_v22, %v2736_v18  ;;  %v2712_v41 = vpop.f32.mrf.mxu0 }
 0x108   : > { %v2739_v8 = vpop.f32.mrf.mxu1 }
 0x109   : > { %v2713_v47 = vpop.f32.mrf.mxu0 }
 0x10a   : > { %v2740_v36 = vpop.f32.mrf.mxu1  ;;  %v2714_v26 = vadd.f32 %v2713_v47, %v2712_v41 }
 0x10b   : > { %v3940_v39 = vadd.f32 %v2740_v36, %v2739_v8  ;;  %v2715_v48 = vpop.f32.mrf.mxu0 }
 0x10c   : > { %v2742_v28 = vpop.f32.mrf.mxu1 }
 0x10d   : > { %v2716_v10 = vpop.f32.mrf.mxu0 }
 0x10e   : > { %v2743_v9 = vpop.f32.mrf.mxu1  ;;  %v2717_v50 = vadd.f32 %v2716_v10, %v2715_v48 }
 0x10f   : > { %v3942_v20 = vadd.f32 %v2743_v9, %v2742_v28 }
 0x110   : > { %v2745_v43 = vpop.f32.mrf.mxu1  ;;  %v2834_v51 = vpop.f32.mrf.mxu0 }
 0x112   : > { %v2746_v49 = vpop.f32.mrf.mxu1  ;;  %v2835_v53 = vpop.f32.mrf.mxu0 }
 0x113   : > { %v3944_v45 = vadd.f32 %v2746_v49, %v2745_v43  ;;  %v2836_v54 = vadd.f32 %v2835_v53, %v2834_v51 }
 0x114   : > { %v2764_v21 = vpop.f32.mrf.mxu1  ;;  %v2837_v56 = vpop.f32.mrf.mxu0 }
 0x116   : > { %v2765_v33 = vpop.f32.mrf.mxu1  ;;  %v2838_v29 = vpop.f32.mrf.mxu0 }
 0x117   : > { %v2766_v52 = vadd.f32 %v2765_v33, %v2764_v21  ;;  %v2839_v59 = vadd.f32 %v2838_v29, %v2837_v56 }
 0x118   : > { %v2767_v15 = vpop.f32.mrf.mxu1 }
 0x119   : > { %v1876_v55 = vadd.f32 %v2766_v52, %v2696_v60  ;;  %v2840_v61 = vpop.f32.mrf.mxu0 }
 0x11a   : > { %v2768_v57 = vpop.f32.mrf.mxu1 }
 0x11b   : > { %v3946_v35 = vadd.f32 %v2836_v54, %v1876_v55  ;;  %v2769_v38 = vadd.f32 %v2768_v57, %v2767_v15  ;;  %v2841_v42 = vpop.f32.mrf.mxu0 }
 0x11c   : > { %v2770_v34 = vpop.f32.mrf.mxu1  ;;  %v2842_v46 = vadd.f32 %v2841_v42, %v2840_v61 }
 0x11d   : > { %v1879_v32 = vadd.f32 %v2769_v38, %v2699_v1  ;;  %v2843_v5 = vpop.f32.mrf.mxu0 }
 0x11e   : > { %v2771_v63 = vpop.f32.mrf.mxu1 }
 0x11f   : > { %v3948_v0 = vadd.f32 %v2839_v59, %v1879_v32  ;;  %v2772_v30 = vadd.f32 %v2771_v63, %v2770_v34  ;;  %v2844_v11 = vpop.f32.mrf.mxu0 }
 0x120   : > { %v2773_v2 = vpop.f32.mrf.mxu1  ;;  %v2845_v17 = vadd.f32 %v2844_v11, %v2843_v5 }
 0x121   : > { %v1884_v3 = vadd.f32 %v2772_v30, %v2702_v6 }
 0x122   : > { %v2774_v60 = vpop.f32.mrf.mxu1  ;;  %v2846_v19 = vpop.f32.mrf.mxu0 }
 0x123   : > { %v3950_v7 = vadd.f32 %v2842_v46, %v1884_v3  ;;  %v2775_v31 = vadd.f32 %v2774_v60, %v2773_v2 }
 0x124   : > { %v2776_v12 = vpop.f32.mrf.mxu1  ;;  %v2847_v40 = vpop.f32.mrf.mxu0 }
 0x125   : > { %v1887_v14 = vadd.f32 %v2775_v31, %v2705_v13  ;;  %v2848_v36 = vadd.f32 %v2847_v40, %v2846_v19 }
 0x126   : > { %v2777_v18 = vpop.f32.mrf.mxu1  ;;  %v2849_v28 = vpop.f32.mrf.mxu0 }
 0x127   : > { %v3952_v1 = vadd.f32 %v2845_v17, %v1887_v14  ;;  %v2778_v22 = vadd.f32 %v2777_v18, %v2776_v12 }
 0x128   : > { %v2779_v25 = vpop.f32.mrf.mxu1  ;;  %v2850_v48 = vpop.f32.mrf.mxu0 }
 0x129   : > { %v1892_v8 = vadd.f32 %v2778_v22, %v2708_v27  ;;  %v2851_v49 = vadd.f32 %v2850_v48, %v2849_v28 }
 0x12a   : > { %v2780_v6 = vpop.f32.mrf.mxu1 }
 0x12b   : > { %v2781_v41 = vadd.f32 %v2780_v6, %v2779_v25  ;;  %v3954_v9 = vadd.f32 %v2848_v36, %v1892_v8  ;;  %v2852_v51 = vpop.f32.mrf.mxu0 }
 0x12c   : > { %v2782_v47 = vpop.f32.mrf.mxu1 }
 0x12d   : > { %v1895_v43 = vadd.f32 %v2781_v41, %v2711_v37  ;;  %v2853_v53 = vpop.f32.mrf.mxu0 }
 0x12e   : > { %v2783_v13 = vpop.f32.mrf.mxu1  ;;  %v2854_v54 = vadd.f32 %v2853_v53, %v2852_v51 }
 0x12f   : > { %v2784_v10 = vadd.f32 %v2783_v13, %v2782_v47  ;;  %v3956_v21 = vadd.f32 %v2851_v49, %v1895_v43  ;;  %v2855_v55 = vpop.f32.mrf.mxu0 }
 0x130   : > { %v2785_v33 = vpop.f32.mrf.mxu1 }
 0x131   : > { %v1900_v52 = vadd.f32 %v2784_v10, %v2714_v26  ;;  %v2856_v29 = vpop.f32.mrf.mxu0 }
 0x132   : > { %v2786_v27 = vpop.f32.mrf.mxu1  ;;  %v2857_v37 = vadd.f32 %v2856_v29, %v2855_v55 }
 0x133   : > { %v2787_v15 = vadd.f32 %v2786_v27, %v2785_v33  ;;  %v3958_v56 = vadd.f32 %v2854_v54, %v1900_v52 }
 0x134   : > { %v2788_v38 = vpop.f32.mrf.mxu1  ;;  %v2858_v61 = vpop.f32.mrf.mxu0 }
 0x135   : > { %v1903_v57 = vadd.f32 %v2787_v15, %v2717_v50 }
 0x136   : > { %v2789_v59 = vpop.f32.mrf.mxu1  ;;  %v2859_v26 = vpop.f32.mrf.mxu0 }
 0x137   : > { %v2790_v34 = vadd.f32 %v2789_v59, %v2788_v38  ;;  %v3960_v32 = vadd.f32 %v2857_v37, %v1903_v57  ;;  %v2860_v2 = vadd.f32 %v2859_v26, %v2858_v61 }
 0x138   : > { %v2791_v63 = vpop.f32.mrf.mxu1  ;;  %v2861_v46 = vpop.f32.mrf.mxu0 }
 0x139   : > { %v1908_v30 = vadd.f32 %v2790_v34, %v3926_v58 }
 0x13a   : > { %v2792_v42 = vpop.f32.mrf.mxu1  ;;  %v2862_v31 = vpop.f32.mrf.mxu0 }
 0x13b   : > { %v2793_v3 = vadd.f32 %v2792_v42, %v2791_v63  ;;  %v3963_v5 = vadd.f32 %v2860_v2, %v1908_v30  ;;  %v2863_v11 = vadd.f32 %v2862_v31, %v2861_v46 }
 0x13c   : > { %v2794_v60 = vpop.f32.mrf.mxu1 }
 0x13d   : > { %v1911_v50 = vadd.f32 %v2793_v3, %v3928_v62  ;;  %v2864_v18 = vpop.f32.mrf.mxu0 }
 0x13e   : > { %v2795_v12 = vpop.f32.mrf.mxu1 }
 0x13f   : > { %v2796_v14 = vadd.f32 %v2795_v12, %v2794_v60  ;;  %v3966_v17 = vadd.f32 %v2863_v11, %v1911_v50  ;;  %v2865_v22 = vpop.f32.mrf.mxu0 }
 0x140   : > { %v2797_v19 = vpop.f32.mrf.mxu1  ;;  %v2866_v8 = vadd.f32 %v2865_v22, %v2864_v18 }
 0x141   : > { %v1916_v58 = vadd.f32 %v2796_v14, %v3930_v44  ;;  %v2867_v36 = vpop.f32.mrf.mxu0 }
 0x142   : > { %v2798_v25 = vpop.f32.mrf.mxu1 }
 0x143   : > { %v2799_v40 = vadd.f32 %v2798_v25, %v2797_v19  ;;  %v3969_v6 = vadd.f32 %v2866_v8, %v1916_v58  ;;  %v2868_v41 = vpop.f32.mrf.mxu0 }
 0x144   : > { %v2800_v28 = vpop.f32.mrf.mxu1  ;;  %v2869_v47 = vadd.f32 %v2868_v41, %v2867_v36 }
 0x145   : > { %v1919_v62 = vadd.f32 %v2799_v40, %v3932_v4 }
 0x146   : > { %v2801_v43 = vpop.f32.mrf.mxu1  ;;  %v2870_v13 = vpop.f32.mrf.mxu0 }
 0x147   : > { %v2802_v48 = vadd.f32 %v2801_v43, %v2800_v28  ;;  %v3972_v49 = vadd.f32 %v2869_v47, %v1919_v62 }
 0x148   : > { %v2803_v10 = vpop.f32.mrf.mxu1  ;;  %v2871_v51 = vpop.f32.mrf.mxu0 }
 0x149   : > { %v1924_v44 = vadd.f32 %v2802_v48, %v3934_v23  ;;  %v2872_v52 = vadd.f32 %v2871_v51, %v2870_v13 }
 0x14a   : > { %v2804_v33 = vpop.f32.mrf.mxu1  ;;  %v2873_v27 = vpop.f32.mrf.mxu0 }
 0x14b   : > { %v2805_v53 = vadd.f32 %v2804_v33, %v2803_v10  ;;  %v3975_v54 = vadd.f32 %v2872_v52, %v1924_v44 }
 0x14c   : > { %v2806_v15 = vpop.f32.mrf.mxu1  ;;  %v2874_v55 = vpop.f32.mrf.mxu0 }
 0x14d   : > { %v1927_v4 = vadd.f32 %v2805_v53, %v3936_v16  ;;  %v2875_v57 = vadd.f32 %v2874_v55, %v2873_v27 }
 0x14e   : > { %v2807_v38 = vpop.f32.mrf.mxu1 }
 0x14f   : > { %v2808_v29 = vadd.f32 %v2807_v38, %v2806_v15  ;;  %v3978_v37 = vadd.f32 %v2875_v57, %v1927_v4  ;;  %v2876_v59 = vpop.f32.mrf.mxu0 }
 0x150   : > { %v2809_v34 = vpop.f32.mrf.mxu1 }
 0x151   : > { %v1932_v23 = vadd.f32 %v2808_v29, %v3938_v24  ;;  %v2877_v61 = vpop.f32.mrf.mxu0 }
 0x152   : > { %v2810_v63 = vpop.f32.mrf.mxu1  ;;  %v2878_v30 = vadd.f32 %v2877_v61, %v2876_v59 }
 0x153   : > { %v2811_v26 = vadd.f32 %v2810_v63, %v2809_v34  ;;  %v2879_v42 = vpop.f32.mrf.mxu0 }
 0x154   : > { %v3981_v2 = vadd.f32 %v2878_v30, %v1932_v23  ;;  %v2812_v3 = vpop.f32.mrf.mxu1 }
 0x155   : > { %v1935_v16 = vadd.f32 %v2811_v26, %v3940_v39  ;;  %v2880_v46 = vpop.f32.mrf.mxu0 }
 0x156   : > { %v2881_v50 = vadd.f32 %v2880_v46, %v2879_v42  ;;  %v2813_v60 = vpop.f32.mrf.mxu1 }
 0x157   : > { %v2814_v31 = vadd.f32 %v2813_v60, %v2812_v3 }
 0x158   : > { %v3984_v11 = vadd.f32 %v2881_v50, %v1935_v16  ;;  %v2882_v12 = vpop.f32.mrf.mxu0  ;;  %v2815_v14 = vpop.f32.mrf.mxu1 }
 0x159   : > { %v1940_v24 = vadd.f32 %v2814_v31, %v3942_v20 }
 0x15a   : > { %v2883_v18 = vpop.f32.mrf.mxu0  ;;  %v2816_v19 = vpop.f32.mrf.mxu1 }
 0x15b   : > { %v2884_v58 = vadd.f32 %v2883_v18, %v2882_v12  ;;  %v2817_v22 = vadd.f32 %v2816_v19, %v2815_v14 }
 0x15c   : > { %v2885_v25 = vpop.f32.mrf.mxu0 }
 0x15d   : > { %v3987_v8 = vadd.f32 %v2884_v58, %v1940_v24  ;;  %v1943_v39 = vadd.f32 %v2817_v22, %v3944_v45 }
 0x15e   : > { %v2886_v40 = vpop.f32.mrf.mxu0  ;;  %v2904_v36 = vpop.f32.mrf.mxu1 }
 0x15f   : > { %v2887_v62 = vadd.f32 %v2886_v40, %v2885_v25 }
 0x160   : > { %v2905_v28 = vpop.f32.mrf.mxu1  ;;  %v2190_v47 = vpop.f32.mrf.mxu0 }
 0x161   : > { %v3990_v41 = vadd.f32 %v2887_v62, %v1943_v39  ;;  %v2906_v43 = vadd.f32 %v2905_v28, %v2904_v36 }
 0x162   : > { %v2907_v48 = vpop.f32.mrf.mxu1  ;;  %v2993_v13 = vpop.f32.mrf.mxu0 }
 0x163   : > { %v2086_v20 = vadd.f32 %v2906_v43, %v3946_v35 }
 0x164   : > { %v2908_v10 = vpop.f32.mrf.mxu1  ;;  %v2193_v44 = vpop.f32.mrf.mxu0 }
 0x165   : > { %v2909_v51 = vadd.f32 %v2908_v10, %v2907_v48  ;;  %v2191_v33 = vadd.f32 %v2190_v47, %v2086_v20 }
 0x166   : > { %v2910_v52 = vpop.f32.mrf.mxu1  ;;  %v2994_v53 = vpop.f32.mrf.mxu0 }
 0x167   : > { %v2089_v45 = vadd.f32 %v2909_v51, %v3948_v0  ;;  %v2374_v57 = vmul.f32 %v2191_v33, %v2191_v33 }
 0x168   : > { %v2911_v27 = vpop.f32.mrf.mxu1  ;;  %v2198_v15 = vpop.f32.mrf.mxu0 }
 0x169   : > { %v2194_v4 = vadd.f32 %v2193_v44, %v2089_v45  ;;  %v2912_v55 = vadd.f32 %v2911_v27, %v2910_v52 }
 0x16a   : > { %v2913_v35 = vpop.f32.mrf.mxu1  ;;  %v2997_v23 = vpop.f32.mrf.mxu0 }
 0x16b   : > { %v2628_v38 = vpack.c.bf16 %v2194_v4, %v2191_v33  ;;  %v2351_v29 = vadd.f32 %v2194_v4, %v2191_v33  ;;  %v2375_v59 = vmul.f32 %v2194_v4, %v2194_v4  ;;  %v2094_v34 = vadd.f32 %v2912_v55, %v3950_v7 }
 0x16c   : > { %v2914_v0 = vpop.f32.mrf.mxu1  ;;  %v2201_v30 = vpop.f32.mrf.mxu0 }
 0x16d   : > { %2629 = vst [vmem:[%s3998_s10] sm:$0xff] %v2628_v38   ;;  %v2392_v61 = vadd.f32 %v2375_v59, %v2374_v57  ;;  %v2199_v63 = vadd.f32 %v2198_v15, %v2094_v34  ;;  %v2915_v26 = vadd.f32 %v2914_v0, %v2913_v35 }
 0x16e   : > { %v2916_v42 = vpop.f32.mrf.mxu1  ;;  %v2998_v50 = vpop.f32.mrf.mxu0 }
 0x16f   : > { %v2352_v16 = vadd.f32 %v2351_v29, %v2199_v63  ;;  %v2376_v3 = vmul.f32 %v2199_v63, %v2199_v63  ;;  %v2097_v46 = vadd.f32 %v2915_v26, %v3952_v1 }
 0x170   : > { %v2917_v60 = vpop.f32.mrf.mxu1  ;;  %v2206_v14 = vpop.f32.mrf.mxu0 }
 0x171   : > { %v2393_v31 = vadd.f32 %v2392_v61, %v2376_v3  ;;  %v2202_v12 = vadd.f32 %v2201_v30, %v2097_v46  ;;  %v2918_v24 = vadd.f32 %v2917_v60, %v2916_v42 }
 0x172   : > { %v2919_v7 = vpop.f32.mrf.mxu1  ;;  %v3001_v25 = vpop.f32.mrf.mxu0 }
 0x173   : > { %v2633_v18 = vpack.c.bf16 %v2202_v12, %v2199_v63  ;;  %v2353_v19 = vadd.f32 %v2352_v16, %v2202_v12  ;;  %v2377_v58 = vmul.f32 %v2202_v12, %v2202_v12  ;;  %v2102_v22 = vadd.f32 %v2918_v24, %v3954_v9 }
 0x174   : > { %v2920_v39 = vpop.f32.mrf.mxu1  ;;  %v2209_v62 = vpop.f32.mrf.mxu0 }
 0x175   : > { %2670 = vst [vmem:[%s3998_s10 + $0x8] sm:$0xff] %v2633_v18   ;;  %v2394_v40 = vadd.f32 %v2393_v31, %v2377_v58  ;;  %v2207_v36 = vadd.f32 %v2206_v14, %v2102_v22  ;;  %v2921_v28 = vadd.f32 %v2920_v39, %v2919_v7 }
 0x176   : > { %v2922_v1 = vpop.f32.mrf.mxu1  ;;  %v3002_v20 = vpop.f32.mrf.mxu0 }
 0x177   : > { %v2354_v47 = vadd.f32 %v2353_v19, %v2207_v36  ;;  %v2378_v43 = vmul.f32 %v2207_v36, %v2207_v36  ;;  %v2105_v48 = vadd.f32 %v2921_v28, %v3956_v21 }
 0x178   : > { %v2923_v13 = vpop.f32.mrf.mxu1  ;;  %v2214_v51 = vpop.f32.mrf.mxu0 }
 0x179   : > { %v2395_v10 = vadd.f32 %v2394_v40, %v2378_v43  ;;  %v2210_v44 = vadd.f32 %v2209_v62, %v2105_v48  ;;  %v2924_v33 = vadd.f32 %v2923_v13, %v2922_v1 }
 0x17a   : > { %v2925_v9 = vpop.f32.mrf.mxu1  ;;  %v3005_v4 = vpop.f32.mrf.mxu0 }
 0x17b   : > { %v2638_v52 = vpack.c.bf16 %v2210_v44, %v2207_v36  ;;  %v2355_v45 = vadd.f32 %v2354_v47, %v2210_v44  ;;  %v2379_v53 = vmul.f32 %v2210_v44, %v2210_v44  ;;  %v2110_v27 = vadd.f32 %v2924_v33, %v3958_v56 }
 0x17c   : > { %v2926_v15 = vpop.f32.mrf.mxu1  ;;  %v2217_v35 = vpop.f32.mrf.mxu0 }
 0x17d   : > { %2671 = vst [vmem:[%s3998_s10 + $0x10] sm:$0xff] %v2638_v52   ;;  %v2396_v55 = vadd.f32 %v2395_v10, %v2379_v53  ;;  %v2215_v57 = vadd.f32 %v2214_v51, %v2110_v27  ;;  %v2927_v38 = vadd.f32 %v2926_v15, %v2925_v9 }
 0x17e   : > { %v2928_v21 = vpop.f32.mrf.mxu1  ;;  %v3006_v23 = vpop.f32.mrf.mxu0 }
 0x17f   : > { %v2356_v29 = vadd.f32 %v2355_v45, %v2215_v57  ;;  %v2380_v59 = vmul.f32 %v2215_v57, %v2215_v57  ;;  %v2113_v34 = vadd.f32 %v2927_v38, %v3960_v32 }
 0x180   : > { %v2929_v0 = vpop.f32.mrf.mxu1  ;;  %v2222_v30 = vpop.f32.mrf.mxu0 }
 0x181   : > { %v2397_v61 = vadd.f32 %v2396_v55, %v2380_v59  ;;  %v2218_v63 = vadd.f32 %v2217_v35, %v2113_v34  ;;  %v2930_v26 = vadd.f32 %v2929_v0, %v2928_v21 }
 0x182   : > { %v2931_v56 = vpop.f32.mrf.mxu1  ;;  %v3009_v50 = vpop.f32.mrf.mxu0 }
 0x183   : > { %v2643_v42 = vpack.c.bf16 %v2218_v63, %v2215_v57  ;;  %v2357_v16 = vadd.f32 %v2356_v29, %v2218_v63  ;;  %v2381_v3 = vmul.f32 %v2218_v63, %v2218_v63  ;;  %v2118_v46 = vadd.f32 %v2930_v26, %v3963_v5 }
 0x184   : > { %v2932_v60 = vpop.f32.mrf.mxu1  ;;  %v2225_v14 = vpop.f32.mrf.mxu0 }
 0x185   : > { %2672 = vst [vmem:[%s3998_s10 + $0x18] sm:$0xff] %v2643_v42   ;;  %v2398_v31 = vadd.f32 %v2397_v61, %v2381_v3  ;;  %v2223_v12 = vadd.f32 %v2222_v30, %v2118_v46  ;;  %v2933_v24 = vadd.f32 %v2932_v60, %v2931_v56 }
 0x186   : > { %v2934_v32 = vpop.f32.mrf.mxu1  ;;  %v3010_v58 = vpop.f32.mrf.mxu0 }
 0x187   : > { %v2358_v7 = vadd.f32 %v2357_v16, %v2223_v12  ;;  %v2382_v18 = vmul.f32 %v2223_v12, %v2223_v12  ;;  %v2121_v19 = vadd.f32 %v2933_v24, %v3966_v17 }
 0x188   : > { %v2935_v22 = vpop.f32.mrf.mxu1  ;;  %v2230_v40 = vpop.f32.mrf.mxu0 }
 0x189   : > { %v2399_v25 = vadd.f32 %v2398_v31, %v2382_v18  ;;  %v2226_v39 = vadd.f32 %v2225_v14, %v2121_v19  ;;  %v2936_v36 = vadd.f32 %v2935_v22, %v2934_v32 }
 0x18a   : > { %v2937_v5 = vpop.f32.mrf.mxu1  ;;  %v3013_v43 = vpop.f32.mrf.mxu0 }
 0x18b   : > { %v2648_v62 = vpack.c.bf16 %v2226_v39, %v2223_v12  ;;  %v2359_v28 = vadd.f32 %v2358_v7, %v2226_v39  ;;  %v2383_v1 = vmul.f32 %v2226_v39, %v2226_v39  ;;  %v2126_v47 = vadd.f32 %v2936_v36, %v3969_v6 }
 0x18c   : > { %v2938_v48 = vpop.f32.mrf.mxu1  ;;  %v2233_v10 = vpop.f32.mrf.mxu0 }
 0x18d   : > { %2673 = vst [vmem:[%s3998_s10 + $0x20] sm:$0xff] %v2648_v62   ;;  %v2400_v20 = vadd.f32 %v2399_v25, %v2383_v1  ;;  %v2231_v13 = vadd.f32 %v2230_v40, %v2126_v47  ;;  %v2939_v44 = vadd.f32 %v2938_v48, %v2937_v5 }
 0x18e   : > { %v2940_v17 = vpop.f32.mrf.mxu1  ;;  %v3014_v52 = vpop.f32.mrf.mxu0 }
 0x18f   : > { %v2360_v51 = vadd.f32 %v2359_v28, %v2231_v13  ;;  %v2384_v33 = vmul.f32 %v2231_v13, %v2231_v13  ;;  %v2129_v9 = vadd.f32 %v2939_v44, %v3972_v49 }
 0x190   : > { %v2941_v45 = vpop.f32.mrf.mxu1  ;;  %v2238_v4 = vpop.f32.mrf.mxu0 }
 0x191   : > { %v2401_v53 = vadd.f32 %v2400_v20, %v2384_v33  ;;  %v2234_v27 = vadd.f32 %v2233_v10, %v2129_v9  ;;  %v2942_v15 = vadd.f32 %v2941_v45, %v2940_v17 }
 0x192   : > { %v2943_v6 = vpop.f32.mrf.mxu1  ;;  %v3017_v21 = vpop.f32.mrf.mxu0 }
 0x193   : > { %v2653_v55 = vpack.c.bf16 %v2234_v27, %v2231_v13  ;;  %v2361_v57 = vadd.f32 %v2360_v51, %v2234_v27  ;;  %v2385_v35 = vmul.f32 %v2234_v27, %v2234_v27  ;;  %v2134_v38 = vadd.f32 %v2942_v15, %v3975_v54 }
 0x194   : > { %v2944_v29 = vpop.f32.mrf.mxu1  ;;  %v2241_v23 = vpop.f32.mrf.mxu0 }
 0x195   : > { %2674 = vst [vmem:[%s3998_s10 + $0x28] sm:$0xff] %v2653_v55   ;;  %v2402_v59 = vadd.f32 %v2401_v53, %v2385_v35  ;;  %v2239_v34 = vadd.f32 %v2238_v4, %v2134_v38  ;;  %v2945_v0 = vadd.f32 %v2944_v29, %v2943_v6 }
 0x196   : > { %v2946_v49 = vpop.f32.mrf.mxu1  ;;  %v3018_v26 = vpop.f32.mrf.mxu0 }
 0x197   : > { %v2362_v61 = vadd.f32 %v2361_v57, %v2239_v34  ;;  %v2386_v63 = vmul.f32 %v2239_v34, %v2239_v34  ;;  %v2137_v30 = vadd.f32 %v2945_v0, %v3978_v37 }
 0x198   : > { %v2947_v56 = vpop.f32.mrf.mxu1  ;;  %v2246_v3 = vpop.f32.mrf.mxu0 }
 0x199   : > { %v2403_v42 = vadd.f32 %v2402_v59, %v2386_v63  ;;  %v2242_v16 = vadd.f32 %v2241_v23, %v2137_v30  ;;  %v2948_v46 = vadd.f32 %v2947_v56, %v2946_v49 }
 0x19a   : > { %v2949_v54 = vpop.f32.mrf.mxu1  ;;  %v3021_v14 = vpop.f32.mrf.mxu0 }
 0x19b   : > { %v2658_v50 = vpack.c.bf16 %v2242_v16, %v2239_v34  ;;  %v2363_v60 = vadd.f32 %v2362_v61, %v2242_v16  ;;  %v2387_v31 = vmul.f32 %v2242_v16, %v2242_v16  ;;  %v2142_v12 = vadd.f32 %v2948_v46, %v3981_v2 }
 0x19c   : > { %v2950_v24 = vpop.f32.mrf.mxu1  ;;  %v2249_v18 = vpop.f32.mrf.mxu0 }
 0x19d   : > { %2675 = vst [vmem:[%s3998_s10 + $0x30] sm:$0xff] %v2658_v50   ;;  %v2404_v32 = vadd.f32 %v2403_v42, %v2387_v31  ;;  %v2247_v7 = vadd.f32 %v2246_v3, %v2142_v12  ;;  %v2951_v19 = vadd.f32 %v2950_v24, %v2949_v54 }
 0x19e   : > { %v2952_v37 = vpop.f32.mrf.mxu1  ;;  %v3022_v39 = vpop.f32.mrf.mxu0 }
 0x19f   : > { %v2364_v58 = vadd.f32 %v2363_v60, %v2247_v7  ;;  %v2388_v22 = vmul.f32 %v2247_v7, %v2247_v7  ;;  %v2145_v25 = vadd.f32 %v2951_v19, %v3984_v11 }
 0x1a0   : > { %v2953_v40 = vpop.f32.mrf.mxu1  ;;  %v2254_v62 = vpop.f32.mrf.mxu0 }
 0x1a1   : > { %v2405_v36 = vadd.f32 %v2404_v32, %v2388_v22  ;;  %v2250_v5 = vadd.f32 %v2249_v18, %v2145_v25  ;;  %v2954_v28 = vadd.f32 %v2953_v40, %v2952_v37 }
 0x1a2   : > { %v2955_v2 = vpop.f32.mrf.mxu1  ;;  %v3025_v20 = vpop.f32.mrf.mxu0 }
 0x1a3   : > { %v2663_v1 = vpack.c.bf16 %v2250_v5, %v2247_v7  ;;  %v2365_v47 = vadd.f32 %v2364_v58, %v2250_v5  ;;  %v2389_v43 = vmul.f32 %v2250_v5, %v2250_v5  ;;  %v2150_v48 = vadd.f32 %v2954_v28, %v3987_v8 }
 0x1a4   : > { %v2956_v13 = vpop.f32.mrf.mxu1  ;;  %v2257_v11 = vpop.f32.mrf.mxu0 }
 0x1a5   : > { %2676 = vst [vmem:[%s3998_s10 + $0x38] sm:$0xff] %v2663_v1   ;;  %v2406_v10 = vadd.f32 %v2405_v36, %v2389_v43  ;;  %v2255_v44 = vadd.f32 %v2254_v62, %v2150_v48  ;;  %v2957_v17 = vadd.f32 %v2956_v13, %v2955_v2 }
 0x1a6   : > { %v3026_v52 = vpop.f32.mrf.mxu0 }
 0x1a7   : > { %v2366_v51 = vadd.f32 %v2365_v47, %v2255_v44  ;;  %v2390_v33 = vmul.f32 %v2255_v44, %v2255_v44  ;;  %v2153_v9 = vadd.f32 %v2957_v17, %v3990_v41 }
 0x1a9   : > { %v2407_v45 = vadd.f32 %v2406_v10, %v2390_v33  ;;  %v2258_v53 = vadd.f32 %v2257_v11, %v2153_v9 }
 0x1ab   : > { %v2668_v27 = vpack.c.bf16 %v2258_v53, %v2255_v44  ;;  %v2367_v4 = vadd.f32 %v2366_v51, %v2258_v53  ;;  %v2391_v8 = vmul.f32 %v2258_v53, %v2258_v53 }
 0x1ad   : > { %2677 = vst [vmem:[%s3998_s10 + $0x40] sm:$0xff] %v2668_v27   ;;  %v2368_v15 = vrot.slane %v2367_v4, 4  ;;  %v2408_v6 = vadd.f32 %v2407_v45, %v2391_v8 }
 0x1af   : > { %v2369_v55 = vadd.f32 %v2368_v15, %v2367_v4  ;;  %v2409_v57 = vrot.slane %v2408_v6, 4 }
 0x1b1   : > { %v2370_v35 = vrot.slane %v2369_v55, 2  ;;  %v2410_v38 = vadd.f32 %v2409_v57, %v2408_v6 }
 0x1b3   : > { %v2371_v21 = vadd.f32 %v2370_v35, %v2369_v55  ;;  %v2411_v29 = vrot.slane %v2410_v38, 2 }
 0x1b5   : > { %v2372_v59 = vrot.slane %v2371_v21, 1  ;;  %v2412_v34 = vadd.f32 %v2411_v29, %v2410_v38 }
 0x1b7   : > { %v2413_v41 = vrot.slane %v2412_v34, 1  ;;  %v2373_v23 = vadd.f32 %v2372_v59, %v2371_v21 }
 0x1b9   : > { %v2414_v0 = vadd.f32 %v2413_v41, %v2412_v34 }
 0x1bb   : > { %v2416_v49 = vsel %vm2415_vm1, %v2373_v23, %v2414_v0 }
 0x1bc   : > { %2417 = vst [vmem:[%s241_s13] sm:$0x3] %v2416_v49 }
 0x1bd PF: > { %s16_s18 = sadd.s32 1, %s3134_s18  }
 0x1be   : > { %p13_p5 = scmp.ge.s32.totalorder %s16_s18, 4  }
 0x1c0   :  { %15 = sbr.rel (!%p13_p5) target bundleno = 1 (0x1), region = 78 }

</bundles_post_ra>
